<compile_context>
chip_gen: v6e
topology: v6e:2x2x1
jax: 0.10.0
libtpu: 0.0.40
codegen_flags: <defaults>
</compile_context>

<pallas_src>
import functools
import math

import jax
import jax.numpy as jnp
from jax.experimental import pallas as pl
from jax.experimental.pallas import tpu as pltpu

# Each grid step processes ROWS * LANES samples.
ROWS = 8      # sublane tile (multiple of 8)
LANES = 256   # lane tile (multiple of 128)


def _dressed_kernel(p_ref, x_ref, out_ref, *, n_features, depth, n_out):
    """One batch tile of DressedQuantumCircuit.forward.

    p_ref   : (P,) f32 in SMEM   -- packed params (see wrapper for layout)
    x_ref   : (n_features, ROWS, LANES) f32 VMEM -- transposed input tile
    out_ref : (n_out, ROWS, LANES) f32 VMEM
    """
    xs = [x_ref[k] for k in range(n_features)]          # each (ROWS, LANES)

    # --- pre_processing: Linear(n_features -> 2) + Sigmoid --------------------
    # Then angle embedding: (H ; RY(z*pi - pi/2)) |0>  ==  (cos(z*pi/2), sin(z*pi/2))
    alpha = []   # |0> amplitude per qubit
    beta = []    # |1> amplitude per qubit
    for q in range(2):
        u = xs[0] * p_ref[q * n_features + 0]
        for k in range(1, n_features):
            u = u + xs[k] * p_ref[q * n_features + k]
        u = u + p_ref[2 * n_features + q]                # bias
        z = 1.0 / (1.0 + jnp.exp(-u))                    # sigmoid (EUP exp)
        phi = (0.5 * math.pi) * z
        alpha.append(jnp.cos(phi))
        beta.append(jnp.sin(phi))

    # --- 2-qubit real statevector, PennyLane ordering |q0 q1> -----------------
    s00 = alpha[0] * alpha[1]
    s01 = alpha[0] * beta[1]
    s10 = beta[0] * alpha[1]
    s11 = beta[0] * beta[1]

    cw_base = 2 * n_features + 2          # cos(arctan(2*w)) table, (depth, 2)
    sw_base = cw_base + 2 * depth         # sin(arctan(2*w)) table, (depth, 2)
    for l in range(depth):
        # CNOT(control=0, target=1): swap |10> <-> |11>
        s10, s11 = s11, s10
        c0 = p_ref[cw_base + 2 * l + 0]
        c1 = p_ref[cw_base + 2 * l + 1]
        t0 = p_ref[sw_base + 2 * l + 0]
        t1 = p_ref[sw_base + 2 * l + 1]
        # RY(gamma_l0) on wire 0  (pairs (00,10) and (01,11))
        s00, s10 = c0 * s00 - t0 * s10, t0 * s00 + c0 * s10
        s01, s11 = c0 * s01 - t0 * s11, t0 * s01 + c0 * s11
        # RY(gamma_l1) on wire 1  (pairs (00,01) and (10,11))
        s00, s01 = c1 * s00 - t1 * s01, t1 * s00 + c1 * s01
        s10, s11 = c1 * s10 - t1 * s11, t1 * s10 + c1 * s11

    # --- expval(PauliZ) on wires 0 and 1 --------------------------------------
    p00 = s00 * s00
    p01 = s01 * s01
    p10 = s10 * s10
    p11 = s11 * s11
    ez0 = (p00 + p01) - (p10 + p11)
    ez1 = (p00 + p10) - (p01 + p11)

    # --- post_processing: Linear(2 -> n_out) ----------------------------------
    w2_base = sw_base + 2 * depth
    b2_base = w2_base + 2 * n_out
    for j in range(n_out):
        o = (ez0 * p_ref[w2_base + 2 * j + 0]
             + ez1 * p_ref[w2_base + 2 * j + 1]
             + p_ref[b2_base + j])
        out_ref[j] = o.astype(out_ref.dtype)


def dressed_quantum_circuit_forward(x, w1, b1, qweights, w2, b2):
    """Forward of DressedQuantumCircuit (angle-embedding, width == 2 qubits).

    x        : (B, n_features) f32
    w1, b1   : pre_processing Linear, PyTorch layout (2, n_features), (2,)
    qweights : (depth, 2) raw circuit parameters
    w2, b2   : post_processing Linear, PyTorch layout (n_out, 2), (n_out,)
    returns  : (B, n_out) f32
    """
    # TODO(synk): the amplitude-embedding Circuit variant is not implemented;
    # DressedQuantumCircuit uses amplitude_embedding=False (angle embedding).
    x = x.astype(jnp.float32)
    B, n_features = x.shape
    width = w1.shape[0]
    assert width == 2 and qweights.shape[1] == 2, "angle-embedding VQC is 2 qubits"
    depth = int(qweights.shape[0])
    n_out = int(w2.shape[0])

    # Circuit weight transform (part of forward): gamma = 2*arctan(2*w).
    # Pack every parameter into ONE flat f32 vector -> single resident SMEM DMA.
    half = jnp.arctan(2.0 * qweights.astype(jnp.float32))      # gamma / 2
    params = jnp.concatenate([
        w1.reshape(-1).astype(jnp.float32),
        b1.reshape(-1).astype(jnp.float32),
        jnp.cos(half).reshape(-1),
        jnp.sin(half).reshape(-1),
        w2.reshape(-1).astype(jnp.float32),
        b2.reshape(-1).astype(jnp.float32),
    ])

    tile = ROWS * LANES
    n_tiles = pl.cdiv(B, tile)
    b_pad = n_tiles * tile

    # Lane-dense layout: batch index n -> (row = n // LANES, lane = n % LANES).
    xp = jnp.pad(x, ((0, b_pad - B), (0, 0)))
    xt = xp.T.reshape(n_features, b_pad // LANES, LANES)

    kernel = functools.partial(_dressed_kernel, n_features=n_features,
                               depth=depth, n_out=n_out)
    out_t = pl.pallas_call(
        kernel,
        out_shape=jax.ShapeDtypeStruct((n_out, b_pad // LANES, LANES), jnp.float32),
        grid=(n_tiles,),
        in_specs=[
            pl.BlockSpec(memory_space=pltpu.MemorySpace.SMEM),          # params
            pl.BlockSpec((n_features, ROWS, LANES), lambda i: (0, i, 0)),  # x tile
        ],
        out_specs=pl.BlockSpec((n_out, ROWS, LANES), lambda i: (0, i, 0)),
        compiler_params=pltpu.CompilerParams(
            dimension_semantics=("parallel",),
        ),
    )(params, xt)

    return out_t.reshape(n_out, b_pad).T[:B]


def _reference_forward(x, w1, b1, qweights, w2, b2):
    """Pure-JAX gate-by-gate reference (same math as the PyTorch module)."""
    z = jax.nn.sigmoid(x @ w1.T + b1)                     # (B, 2)
    theta = z * jnp.pi - jnp.pi / 2.0                     # data-dependent RY angles
    gamma = 2.0 * jnp.arctan(2.0 * qweights)              # (depth, 2)

    B = x.shape[0]
    state = jnp.zeros((B, 2, 2), jnp.float32).at[:, 0, 0].set(1.0)   # |00>, [n,q0,q1]
    H = jnp.array([[1.0, 1.0], [1.0, -1.0]], jnp.float32) / jnp.sqrt(2.0)

    def ry(a):
        c, s = jnp.cos(a / 2.0), jnp.sin(a / 2.0)
        return jnp.stack([jnp.stack([c, -s], -1), jnp.stack([s, c], -1)], -2)

    state = jnp.einsum('ab,nbc->nac', H, state)                    # H wire 0
    state = jnp.einsum('cb,nab->nac', H, state)                    # H wire 1
    state = jnp.einsum('nab,nbc->nac', ry(theta[:, 0]), state)     # RY wire 0
    state = jnp.einsum('ncb,nab->nac', ry(theta[:, 1]), state)     # RY wire 1
    for l in range(qweights.shape[0]):
        state = state.at[:, 1, :].set(state[:, 1, ::-1])           # CNOT(0 -> 1)
        state = jnp.einsum('ab,nbc->nac', ry(gamma[l, 0]), state)  # RY wire 0
        state = jnp.einsum('cb,nab->nac', ry(gamma[l, 1]), state)  # RY wire 1
    probs = state * state
    ez0 = probs[:, 0, :].sum(-1) - probs[:, 1, :].sum(-1)
    ez1 = probs[:, :, 0].sum(-1) - probs[:, :, 1].sum(-1)
    q = jnp.stack([ez0, ez1], axis=-1)
    return q @ w2.T + b2


if __name__ == "__main__":
    input_dimension = 4      # BankNote features
    num_classes = 2          # -> VQC width = 2 qubits
    width = 2
    depth = 4
    batch = 2500             # many rows per call so the batch grid axis is exercised

    key = jax.random.PRNGKey(0)
    kx, k1, k2, k3, k4, k5 = jax.random.split(key, 6)
    x = jax.random.uniform(kx, (batch, input_dimension), jnp.float32)  # MinMax-scaled-like

    bound1 = 1.0 / math.sqrt(input_dimension)
    bound2 = 1.0 / math.sqrt(width)
    w1 = jax.random.uniform(k1, (width, input_dimension), jnp.float32, -bound1, bound1)
    b1 = jax.random.uniform(k2, (width,), jnp.float32, -bound1, bound1)
    qweights = jax.random.normal(k3, (depth, width), jnp.float32)      # torch.randn-like
    w2 = jax.random.uniform(k4, (num_classes, width), jnp.float32, -bound2, bound2)
    b2 = jax.random.uniform(k5, (num_classes,), jnp.float32, -bound2, bound2)

    out = dressed_quantum_circuit_forward(x, w1, b1, qweights, w2, b2)
    out = jax.block_until_ready(out)

    ref = _reference_forward(x, w1, b1, qweights, w2, b2)
    assert out.shape == (batch, num_classes), out.shape
    err = float(jnp.max(jnp.abs(out - ref)))
    assert err < 2e-4, f"max abs error {err}"
    print("KERNEL_OK")
</pallas_src>

<mosaic_0001>
module attributes {stable_mosaic.version = 11 : i64} {
  func.func @_dressed_kernel(%arg0: i32, %arg1: memref<32xf32, #tpu.memory_space<smem>>, %arg2: memref<4x8x256xf32, #tpu.memory_space<vmem>>, %arg3: memref<2x8x256xf32, #tpu.memory_space<vmem>>) attributes {dimension_semantics = [#tpu.dimension_semantics<parallel>], iteration_bounds = array<i64: 2>, scalar_prefetch = 0 : i64, scratch_operands = 0 : i64, tpu.core_type = #tpu.core_type<tc>, window_params = [{transform_indices = @transform_0, window_bounds = array<i64: 32>}, {transform_indices = @transform_1, window_bounds = array<i64: 4, 8, 256>}, {transform_indices = @transform_2, window_bounds = array<i64: 2, 8, 256>}]} {
    %c0 = arith.constant 0 : index
    %c0_0 = arith.constant 0 : index
    %c0_1 = arith.constant 0 : index
    %0 = vector.load %arg2[%c0, %c0_0, %c0_1] : memref<4x8x256xf32, #tpu.memory_space<vmem>>, vector<1x8x256xf32>
    %1 = vector.shape_cast %0 : vector<1x8x256xf32> to vector<8x256xf32>
    %c1 = arith.constant 1 : index
    %c0_2 = arith.constant 0 : index
    %c0_3 = arith.constant 0 : index
    %2 = vector.load %arg2[%c1, %c0_2, %c0_3] : memref<4x8x256xf32, #tpu.memory_space<vmem>>, vector<1x8x256xf32>
    %3 = vector.shape_cast %2 : vector<1x8x256xf32> to vector<8x256xf32>
    %c2 = arith.constant 2 : index
    %c0_4 = arith.constant 0 : index
    %c0_5 = arith.constant 0 : index
    %4 = vector.load %arg2[%c2, %c0_4, %c0_5] : memref<4x8x256xf32, #tpu.memory_space<vmem>>, vector<1x8x256xf32>
    %5 = vector.shape_cast %4 : vector<1x8x256xf32> to vector<8x256xf32>
    %c3 = arith.constant 3 : index
    %c0_6 = arith.constant 0 : index
    %c0_7 = arith.constant 0 : index
    %6 = vector.load %arg2[%c3, %c0_6, %c0_7] : memref<4x8x256xf32, #tpu.memory_space<vmem>>, vector<1x8x256xf32>
    %7 = vector.shape_cast %6 : vector<1x8x256xf32> to vector<8x256xf32>
    %c0_8 = arith.constant 0 : index
    %8 = memref.load %arg1[%c0_8] : memref<32xf32, #tpu.memory_space<smem>>
    %9 = vector.broadcast %8 : f32 to vector<8x256xf32>
    %10 = arith.mulf %1, %9 : vector<8x256xf32>
    %c1_9 = arith.constant 1 : index
    %11 = memref.load %arg1[%c1_9] : memref<32xf32, #tpu.memory_space<smem>>
    %12 = vector.broadcast %11 : f32 to vector<8x256xf32>
    %13 = arith.mulf %3, %12 : vector<8x256xf32>
    %14 = arith.addf %10, %13 : vector<8x256xf32>
    %c2_10 = arith.constant 2 : index
    %15 = memref.load %arg1[%c2_10] : memref<32xf32, #tpu.memory_space<smem>>
    %16 = vector.broadcast %15 : f32 to vector<8x256xf32>
    %17 = arith.mulf %5, %16 : vector<8x256xf32>
    %18 = arith.addf %14, %17 : vector<8x256xf32>
    %c3_11 = arith.constant 3 : index
    %19 = memref.load %arg1[%c3_11] : memref<32xf32, #tpu.memory_space<smem>>
    %20 = vector.broadcast %19 : f32 to vector<8x256xf32>
    %21 = arith.mulf %7, %20 : vector<8x256xf32>
    %22 = arith.addf %18, %21 : vector<8x256xf32>
    %c8 = arith.constant 8 : index
    %23 = memref.load %arg1[%c8] : memref<32xf32, #tpu.memory_space<smem>>
    %24 = vector.broadcast %23 : f32 to vector<8x256xf32>
    %25 = arith.addf %22, %24 : vector<8x256xf32>
    %cst = arith.constant 0.000000e+00 : f32
    %26 = vector.broadcast %cst : f32 to vector<8x256xf32>
    %27 = arith.subf %26, %25 : vector<8x256xf32>
    %28 = math.exp %27 : vector<8x256xf32>
    %cst_12 = arith.constant 1.000000e+00 : f32
    %29 = vector.broadcast %cst_12 : f32 to vector<8x256xf32>
    %30 = arith.addf %29, %28 : vector<8x256xf32>
    %cst_13 = arith.constant 1.000000e+00 : f32
    %31 = vector.broadcast %cst_13 : f32 to vector<8x256xf32>
    %32 = arith.divf %31, %30 : vector<8x256xf32>
    %cst_14 = arith.constant 1.57079637 : f32
    %33 = vector.broadcast %cst_14 : f32 to vector<8x256xf32>
    %34 = arith.mulf %33, %32 : vector<8x256xf32>
    %35 = math.cos %34 : vector<8x256xf32>
    %36 = math.sin %34 : vector<8x256xf32>
    %c4 = arith.constant 4 : index
    %37 = memref.load %arg1[%c4] : memref<32xf32, #tpu.memory_space<smem>>
    %38 = vector.broadcast %37 : f32 to vector<8x256xf32>
    %39 = arith.mulf %1, %38 : vector<8x256xf32>
    %c5 = arith.constant 5 : index
    %40 = memref.load %arg1[%c5] : memref<32xf32, #tpu.memory_space<smem>>
    %41 = vector.broadcast %40 : f32 to vector<8x256xf32>
    %42 = arith.mulf %3, %41 : vector<8x256xf32>
    %43 = arith.addf %39, %42 : vector<8x256xf32>
    %c6 = arith.constant 6 : index
    %44 = memref.load %arg1[%c6] : memref<32xf32, #tpu.memory_space<smem>>
    %45 = vector.broadcast %44 : f32 to vector<8x256xf32>
    %46 = arith.mulf %5, %45 : vector<8x256xf32>
    %47 = arith.addf %43, %46 : vector<8x256xf32>
    %c7 = arith.constant 7 : index
    %48 = memref.load %arg1[%c7] : memref<32xf32, #tpu.memory_space<smem>>
    %49 = vector.broadcast %48 : f32 to vector<8x256xf32>
    %50 = arith.mulf %7, %49 : vector<8x256xf32>
    %51 = arith.addf %47, %50 : vector<8x256xf32>
    %c9 = arith.constant 9 : index
    %52 = memref.load %arg1[%c9] : memref<32xf32, #tpu.memory_space<smem>>
    %53 = vector.broadcast %52 : f32 to vector<8x256xf32>
    %54 = arith.addf %51, %53 : vector<8x256xf32>
    %cst_15 = arith.constant 0.000000e+00 : f32
    %55 = vector.broadcast %cst_15 : f32 to vector<8x256xf32>
    %56 = arith.subf %55, %54 : vector<8x256xf32>
    %57 = math.exp %56 : vector<8x256xf32>
    %cst_16 = arith.constant 1.000000e+00 : f32
    %58 = vector.broadcast %cst_16 : f32 to vector<8x256xf32>
    %59 = arith.addf %58, %57 : vector<8x256xf32>
    %cst_17 = arith.constant 1.000000e+00 : f32
    %60 = vector.broadcast %cst_17 : f32 to vector<8x256xf32>
    %61 = arith.divf %60, %59 : vector<8x256xf32>
    %cst_18 = arith.constant 1.57079637 : f32
    %62 = vector.broadcast %cst_18 : f32 to vector<8x256xf32>
    %63 = arith.mulf %62, %61 : vector<8x256xf32>
    %64 = math.cos %63 : vector<8x256xf32>
    %65 = math.sin %63 : vector<8x256xf32>
    %66 = arith.mulf %35, %64 : vector<8x256xf32>
    %67 = arith.mulf %35, %65 : vector<8x256xf32>
    %68 = arith.mulf %36, %64 : vector<8x256xf32>
    %69 = arith.mulf %36, %65 : vector<8x256xf32>
    %c10 = arith.constant 10 : index
    %70 = memref.load %arg1[%c10] : memref<32xf32, #tpu.memory_space<smem>>
    %c11 = arith.constant 11 : index
    %71 = memref.load %arg1[%c11] : memref<32xf32, #tpu.memory_space<smem>>
    %c18 = arith.constant 18 : index
    %72 = memref.load %arg1[%c18] : memref<32xf32, #tpu.memory_space<smem>>
    %c19 = arith.constant 19 : index
    %73 = memref.load %arg1[%c19] : memref<32xf32, #tpu.memory_space<smem>>
    %74 = vector.broadcast %70 : f32 to vector<8x256xf32>
    %75 = arith.mulf %74, %66 : vector<8x256xf32>
    %76 = vector.broadcast %72 : f32 to vector<8x256xf32>
    %77 = arith.mulf %76, %69 : vector<8x256xf32>
    %78 = arith.subf %75, %77 : vector<8x256xf32>
    %79 = vector.broadcast %72 : f32 to vector<8x256xf32>
    %80 = arith.mulf %79, %66 : vector<8x256xf32>
    %81 = vector.broadcast %70 : f32 to vector<8x256xf32>
    %82 = arith.mulf %81, %69 : vector<8x256xf32>
    %83 = arith.addf %80, %82 : vector<8x256xf32>
    %84 = vector.broadcast %70 : f32 to vector<8x256xf32>
    %85 = arith.mulf %84, %67 : vector<8x256xf32>
    %86 = vector.broadcast %72 : f32 to vector<8x256xf32>
    %87 = arith.mulf %86, %68 : vector<8x256xf32>
    %88 = arith.subf %85, %87 : vector<8x256xf32>
    %89 = vector.broadcast %72 : f32 to vector<8x256xf32>
    %90 = arith.mulf %89, %67 : vector<8x256xf32>
    %91 = vector.broadcast %70 : f32 to vector<8x256xf32>
    %92 = arith.mulf %91, %68 : vector<8x256xf32>
    %93 = arith.addf %90, %92 : vector<8x256xf32>
    %94 = vector.broadcast %71 : f32 to vector<8x256xf32>
    %95 = arith.mulf %94, %78 : vector<8x256xf32>
    %96 = vector.broadcast %73 : f32 to vector<8x256xf32>
    %97 = arith.mulf %96, %88 : vector<8x256xf32>
    %98 = arith.subf %95, %97 : vector<8x256xf32>
    %99 = vector.broadcast %73 : f32 to vector<8x256xf32>
    %100 = arith.mulf %99, %78 : vector<8x256xf32>
    %101 = vector.broadcast %71 : f32 to vector<8x256xf32>
    %102 = arith.mulf %101, %88 : vector<8x256xf32>
    %103 = arith.addf %100, %102 : vector<8x256xf32>
    %104 = vector.broadcast %71 : f32 to vector<8x256xf32>
    %105 = arith.mulf %104, %83 : vector<8x256xf32>
    %106 = vector.broadcast %73 : f32 to vector<8x256xf32>
    %107 = arith.mulf %106, %93 : vector<8x256xf32>
    %108 = arith.subf %105, %107 : vector<8x256xf32>
    %109 = vector.broadcast %73 : f32 to vector<8x256xf32>
    %110 = arith.mulf %109, %83 : vector<8x256xf32>
    %111 = vector.broadcast %71 : f32 to vector<8x256xf32>
    %112 = arith.mulf %111, %93 : vector<8x256xf32>
    %113 = arith.addf %110, %112 : vector<8x256xf32>
    %c12 = arith.constant 12 : index
    %114 = memref.load %arg1[%c12] : memref<32xf32, #tpu.memory_space<smem>>
    %c13 = arith.constant 13 : index
    %115 = memref.load %arg1[%c13] : memref<32xf32, #tpu.memory_space<smem>>
    %c20 = arith.constant 20 : index
    %116 = memref.load %arg1[%c20] : memref<32xf32, #tpu.memory_space<smem>>
    %c21 = arith.constant 21 : index
    %117 = memref.load %arg1[%c21] : memref<32xf32, #tpu.memory_space<smem>>
    %118 = vector.broadcast %114 : f32 to vector<8x256xf32>
    %119 = arith.mulf %118, %98 : vector<8x256xf32>
    %120 = vector.broadcast %116 : f32 to vector<8x256xf32>
    %121 = arith.mulf %120, %113 : vector<8x256xf32>
    %122 = arith.subf %119, %121 : vector<8x256xf32>
    %123 = vector.broadcast %116 : f32 to vector<8x256xf32>
    %124 = arith.mulf %123, %98 : vector<8x256xf32>
    %125 = vector.broadcast %114 : f32 to vector<8x256xf32>
    %126 = arith.mulf %125, %113 : vector<8x256xf32>
    %127 = arith.addf %124, %126 : vector<8x256xf32>
    %128 = vector.broadcast %114 : f32 to vector<8x256xf32>
    %129 = arith.mulf %128, %103 : vector<8x256xf32>
    %130 = vector.broadcast %116 : f32 to vector<8x256xf32>
    %131 = arith.mulf %130, %108 : vector<8x256xf32>
    %132 = arith.subf %129, %131 : vector<8x256xf32>
    %133 = vector.broadcast %116 : f32 to vector<8x256xf32>
    %134 = arith.mulf %133, %103 : vector<8x256xf32>
    %135 = vector.broadcast %114 : f32 to vector<8x256xf32>
    %136 = arith.mulf %135, %108 : vector<8x256xf32>
    %137 = arith.addf %134, %136 : vector<8x256xf32>
    %138 = vector.broadcast %115 : f32 to vector<8x256xf32>
    %139 = arith.mulf %138, %122 : vector<8x256xf32>
    %140 = vector.broadcast %117 : f32 to vector<8x256xf32>
    %141 = arith.mulf %140, %132 : vector<8x256xf32>
    %142 = arith.subf %139, %141 : vector<8x256xf32>
    %143 = vector.broadcast %117 : f32 to vector<8x256xf32>
    %144 = arith.mulf %143, %122 : vector<8x256xf32>
    %145 = vector.broadcast %115 : f32 to vector<8x256xf32>
    %146 = arith.mulf %145, %132 : vector<8x256xf32>
    %147 = arith.addf %144, %146 : vector<8x256xf32>
    %148 = vector.broadcast %115 : f32 to vector<8x256xf32>
    %149 = arith.mulf %148, %127 : vector<8x256xf32>
    %150 = vector.broadcast %117 : f32 to vector<8x256xf32>
    %151 = arith.mulf %150, %137 : vector<8x256xf32>
    %152 = arith.subf %149, %151 : vector<8x256xf32>
    %153 = vector.broadcast %117 : f32 to vector<8x256xf32>
    %154 = arith.mulf %153, %127 : vector<8x256xf32>
    %155 = vector.broadcast %115 : f32 to vector<8x256xf32>
    %156 = arith.mulf %155, %137 : vector<8x256xf32>
    %157 = arith.addf %154, %156 : vector<8x256xf32>
    %c14 = arith.constant 14 : index
    %158 = memref.load %arg1[%c14] : memref<32xf32, #tpu.memory_space<smem>>
    %c15 = arith.constant 15 : index
    %159 = memref.load %arg1[%c15] : memref<32xf32, #tpu.memory_space<smem>>
    %c22 = arith.constant 22 : index
    %160 = memref.load %arg1[%c22] : memref<32xf32, #tpu.memory_space<smem>>
    %c23 = arith.constant 23 : index
    %161 = memref.load %arg1[%c23] : memref<32xf32, #tpu.memory_space<smem>>
    %162 = vector.broadcast %158 : f32 to vector<8x256xf32>
    %163 = arith.mulf %162, %142 : vector<8x256xf32>
    %164 = vector.broadcast %160 : f32 to vector<8x256xf32>
    %165 = arith.mulf %164, %157 : vector<8x256xf32>
    %166 = arith.subf %163, %165 : vector<8x256xf32>
    %167 = vector.broadcast %160 : f32 to vector<8x256xf32>
    %168 = arith.mulf %167, %142 : vector<8x256xf32>
    %169 = vector.broadcast %158 : f32 to vector<8x256xf32>
    %170 = arith.mulf %169, %157 : vector<8x256xf32>
    %171 = arith.addf %168, %170 : vector<8x256xf32>
    %172 = vector.broadcast %158 : f32 to vector<8x256xf32>
    %173 = arith.mulf %172, %147 : vector<8x256xf32>
    %174 = vector.broadcast %160 : f32 to vector<8x256xf32>
    %175 = arith.mulf %174, %152 : vector<8x256xf32>
    %176 = arith.subf %173, %175 : vector<8x256xf32>
    %177 = vector.broadcast %160 : f32 to vector<8x256xf32>
    %178 = arith.mulf %177, %147 : vector<8x256xf32>
    %179 = vector.broadcast %158 : f32 to vector<8x256xf32>
    %180 = arith.mulf %179, %152 : vector<8x256xf32>
    %181 = arith.addf %178, %180 : vector<8x256xf32>
    %182 = vector.broadcast %159 : f32 to vector<8x256xf32>
    %183 = arith.mulf %182, %166 : vector<8x256xf32>
    %184 = vector.broadcast %161 : f32 to vector<8x256xf32>
    %185 = arith.mulf %184, %176 : vector<8x256xf32>
    %186 = arith.subf %183, %185 : vector<8x256xf32>
    %187 = vector.broadcast %161 : f32 to vector<8x256xf32>
    %188 = arith.mulf %187, %166 : vector<8x256xf32>
    %189 = vector.broadcast %159 : f32 to vector<8x256xf32>
    %190 = arith.mulf %189, %176 : vector<8x256xf32>
    %191 = arith.addf %188, %190 : vector<8x256xf32>
    %192 = vector.broadcast %159 : f32 to vector<8x256xf32>
    %193 = arith.mulf %192, %171 : vector<8x256xf32>
    %194 = vector.broadcast %161 : f32 to vector<8x256xf32>
    %195 = arith.mulf %194, %181 : vector<8x256xf32>
    %196 = arith.subf %193, %195 : vector<8x256xf32>
    %197 = vector.broadcast %161 : f32 to vector<8x256xf32>
    %198 = arith.mulf %197, %171 : vector<8x256xf32>
    %199 = vector.broadcast %159 : f32 to vector<8x256xf32>
    %200 = arith.mulf %199, %181 : vector<8x256xf32>
    %201 = arith.addf %198, %200 : vector<8x256xf32>
    %c16 = arith.constant 16 : index
    %202 = memref.load %arg1[%c16] : memref<32xf32, #tpu.memory_space<smem>>
    %c17 = arith.constant 17 : index
    %203 = memref.load %arg1[%c17] : memref<32xf32, #tpu.memory_space<smem>>
    %c24 = arith.constant 24 : index
    %204 = memref.load %arg1[%c24] : memref<32xf32, #tpu.memory_space<smem>>
    %c25 = arith.constant 25 : index
    %205 = memref.load %arg1[%c25] : memref<32xf32, #tpu.memory_space<smem>>
    %206 = vector.broadcast %202 : f32 to vector<8x256xf32>
    %207 = arith.mulf %206, %186 : vector<8x256xf32>
    %208 = vector.broadcast %204 : f32 to vector<8x256xf32>
    %209 = arith.mulf %208, %201 : vector<8x256xf32>
    %210 = arith.subf %207, %209 : vector<8x256xf32>
    %211 = vector.broadcast %204 : f32 to vector<8x256xf32>
    %212 = arith.mulf %211, %186 : vector<8x256xf32>
    %213 = vector.broadcast %202 : f32 to vector<8x256xf32>
    %214 = arith.mulf %213, %201 : vector<8x256xf32>
    %215 = arith.addf %212, %214 : vector<8x256xf32>
    %216 = vector.broadcast %202 : f32 to vector<8x256xf32>
    %217 = arith.mulf %216, %191 : vector<8x256xf32>
    %218 = vector.broadcast %204 : f32 to vector<8x256xf32>
    %219 = arith.mulf %218, %196 : vector<8x256xf32>
    %220 = arith.subf %217, %219 : vector<8x256xf32>
    %221 = vector.broadcast %204 : f32 to vector<8x256xf32>
    %222 = arith.mulf %221, %191 : vector<8x256xf32>
    %223 = vector.broadcast %202 : f32 to vector<8x256xf32>
    %224 = arith.mulf %223, %196 : vector<8x256xf32>
    %225 = arith.addf %222, %224 : vector<8x256xf32>
    %226 = vector.broadcast %203 : f32 to vector<8x256xf32>
    %227 = arith.mulf %226, %210 : vector<8x256xf32>
    %228 = vector.broadcast %205 : f32 to vector<8x256xf32>
    %229 = arith.mulf %228, %220 : vector<8x256xf32>
    %230 = arith.subf %227, %229 : vector<8x256xf32>
    %231 = vector.broadcast %205 : f32 to vector<8x256xf32>
    %232 = arith.mulf %231, %210 : vector<8x256xf32>
    %233 = vector.broadcast %203 : f32 to vector<8x256xf32>
    %234 = arith.mulf %233, %220 : vector<8x256xf32>
    %235 = arith.addf %232, %234 : vector<8x256xf32>
    %236 = vector.broadcast %203 : f32 to vector<8x256xf32>
    %237 = arith.mulf %236, %215 : vector<8x256xf32>
    %238 = vector.broadcast %205 : f32 to vector<8x256xf32>
    %239 = arith.mulf %238, %225 : vector<8x256xf32>
    %240 = arith.subf %237, %239 : vector<8x256xf32>
    %241 = vector.broadcast %205 : f32 to vector<8x256xf32>
    %242 = arith.mulf %241, %215 : vector<8x256xf32>
    %243 = vector.broadcast %203 : f32 to vector<8x256xf32>
    %244 = arith.mulf %243, %225 : vector<8x256xf32>
    %245 = arith.addf %242, %244 : vector<8x256xf32>
    %246 = arith.mulf %230, %230 : vector<8x256xf32>
    %247 = arith.mulf %235, %235 : vector<8x256xf32>
    %248 = arith.mulf %240, %240 : vector<8x256xf32>
    %249 = arith.mulf %245, %245 : vector<8x256xf32>
    %250 = arith.addf %246, %247 : vector<8x256xf32>
    %251 = arith.addf %248, %249 : vector<8x256xf32>
    %252 = arith.subf %250, %251 : vector<8x256xf32>
    %253 = arith.addf %246, %248 : vector<8x256xf32>
    %254 = arith.addf %247, %249 : vector<8x256xf32>
    %255 = arith.subf %253, %254 : vector<8x256xf32>
    %c26 = arith.constant 26 : index
    %256 = memref.load %arg1[%c26] : memref<32xf32, #tpu.memory_space<smem>>
    %257 = vector.broadcast %256 : f32 to vector<8x256xf32>
    %258 = arith.mulf %252, %257 : vector<8x256xf32>
    %c27 = arith.constant 27 : index
    %259 = memref.load %arg1[%c27] : memref<32xf32, #tpu.memory_space<smem>>
    %260 = vector.broadcast %259 : f32 to vector<8x256xf32>
    %261 = arith.mulf %255, %260 : vector<8x256xf32>
    %262 = arith.addf %258, %261 : vector<8x256xf32>
    %c30 = arith.constant 30 : index
    %263 = memref.load %arg1[%c30] : memref<32xf32, #tpu.memory_space<smem>>
    %264 = vector.broadcast %263 : f32 to vector<8x256xf32>
    %265 = arith.addf %262, %264 : vector<8x256xf32>
    %c0_19 = arith.constant 0 : index
    %c0_20 = arith.constant 0 : index
    %c0_21 = arith.constant 0 : index
    %266 = vector.load %arg3[%c0_19, %c0_20, %c0_21] : memref<2x8x256xf32, #tpu.memory_space<vmem>>, vector<1x8x256xf32>
    %267 = vector.shape_cast %266 : vector<1x8x256xf32> to vector<8x256xf32>
    %268 = vector.shape_cast %265 : vector<8x256xf32> to vector<1x8x256xf32>
    tpu.vector_store %arg3[%c0_19, %c0_20, %c0_21], %268 {strides = array<i32>} : memref<2x8x256xf32, #tpu.memory_space<vmem>>, vector<1x8x256xf32>,
    %c28 = arith.constant 28 : index
    %269 = memref.load %arg1[%c28] : memref<32xf32, #tpu.memory_space<smem>>
    %270 = vector.broadcast %269 : f32 to vector<8x256xf32>
    %271 = arith.mulf %252, %270 : vector<8x256xf32>
    %c29 = arith.constant 29 : index
    %272 = memref.load %arg1[%c29] : memref<32xf32, #tpu.memory_space<smem>>
    %273 = vector.broadcast %272 : f32 to vector<8x256xf32>
    %274 = arith.mulf %255, %273 : vector<8x256xf32>
    %275 = arith.addf %271, %274 : vector<8x256xf32>
    %c31 = arith.constant 31 : index
    %276 = memref.load %arg1[%c31] : memref<32xf32, #tpu.memory_space<smem>>
    %277 = vector.broadcast %276 : f32 to vector<8x256xf32>
    %278 = arith.addf %275, %277 : vector<8x256xf32>
    %c1_22 = arith.constant 1 : index
    %c0_23 = arith.constant 0 : index
    %c0_24 = arith.constant 0 : index
    %279 = vector.load %arg3[%c1_22, %c0_23, %c0_24] : memref<2x8x256xf32, #tpu.memory_space<vmem>>, vector<1x8x256xf32>
    %280 = vector.shape_cast %279 : vector<1x8x256xf32> to vector<8x256xf32>
    %281 = vector.shape_cast %278 : vector<8x256xf32> to vector<1x8x256xf32>
    tpu.vector_store %arg3[%c1_22, %c0_23, %c0_24], %281 {strides = array<i32>} : memref<2x8x256xf32, #tpu.memory_space<vmem>>, vector<1x8x256xf32>,
    return
  }
  func.func @transform_0(%arg0: i32) -> i32 {
    %c0_i32 = arith.constant 0 : i32
    %c0_i32_0 = arith.constant 0 : i32
    return %c0_i32 : i32
  }
  func.func @transform_1(%arg0: i32) -> (i32, i32, i32) {
    %c0_i32 = arith.constant 0 : i32
    %c0_i32_0 = arith.constant 0 : i32
    %c0_i32_1 = arith.constant 0 : i32
    return %c0_i32, %arg0, %c0_i32_0 : i32, i32, i32
  }
  func.func @transform_2(%arg0: i32) -> (i32, i32, i32) {
    %c0_i32 = arith.constant 0 : i32
    %c0_i32_0 = arith.constant 0 : i32
    %c0_i32_1 = arith.constant 0 : i32
    return %c0_i32, %arg0, %c0_i32_0 : i32, i32, i32
  }
}

</mosaic_0001>

<bundles_post_ra>
// kernel: tpu_custom_call.1
= control target key start
LH: loop header
LB: loop body
LE: loop exit
PB: predicated region body
PF: predicated region fallthrough
CT: control target
= control target key end

     0   :  { %7 = vsyncpa [#allocation5], 0  ;;  %s2569_s0 = inlined_call_operand.hbm [shape: f32[32], index: 0, kind: input, shape index: {}]   ;;  %s2570_s1 = inlined_call_operand.hbm [shape: f32[4,16,256], index: 1, kind: input, shape index: {}]   ;;  %s2571_s2 = inlined_call_operand.hbm [shape: f32[2,16,256], index: 2, kind: output, shape index: {}]  }
   0x1   :  { %8 = vsyncpa [#allocation3], 0 }
   0x2   :  { %10 = vsyncpa [#allocation3 + $0x1], 0 }
   0x3   :  { %11 = vsyncpa [#allocation4], 0 }
   0x4   :  { %13 = vsyncpa [#allocation4 + $0x1], 0  ;;  %s1822_s9 = smov 0   ;;  %s1824_s10 = smov 0  }
   0x5   :  { %s1826_s11 = smov 0   ;;  %s1828_s12 = smov 0  }
   0x6 LB: > { %s1843_s13 = sadd.s32 4294967295, %s1790_s12   ;;  %s1477_s14 = sadd.s32 4294967294, %s1790_s12   ;;  %s1790_s12 = sphi %s1828_s12, %s2601_s12   ;;  %s1786_s11 = sphi %s1826_s11, %s2600_s11   ;;  %s1782_s10 = sphi %s1824_s10, %s2599_s10   ;;  %s1778_s9 = sphi %s1822_s9, %s2598_s9  }
   0x7   : > { %s1847_s15 = sadd.s32 1, %s1790_s12   ;;  %s47_s16 = sadd.s32 1, %s1786_s11 }
   0x8   : > { %s44_s17 = ssub.s32 %s1790_s12, %s1847_s15  ;;  %p54_p0 = scmp.ne.s32.totalorder %s1786_s11, %s1782_s10 }
   0x9   : > { %p45_p1 = scmp.eq.s32.totalorder %s44_s17, 0  ;;  %p55_p2 = scmp.eq.s32.totalorder %s1790_s12, 0 }
   0xa   : > { %p60_p3 = scmp.ne.s32.totalorder %s1782_s10, %s1778_s9  ;;  %p2572_p4 = scmp.eq.s32.totalorder %s1843_s13, 0 }
   0xb   : > { %s1859_s18 = scalar_select %p45_p1, %s1786_s11, %s47_s16  }
   0xc   : > { %p1861_p5 = por %p55_p2, %p54_p0  ;;  %p1867_p6 = por %p2572_p4, %p60_p3 }
   0xd   : > { %p84_p7 = scmp.eq.s32.totalorder %s1843_s13, 1  ;;  %p90_p8 = scmp.eq.s32.totalorder %s1477_s14, 1 }
   0xe   : > { %s2577_s20 = scalar_select %p1867_p6, 1, 0 }
   0xf   : > { %p1478_p9 = scmp.ge.s32.totalorder %s1790_s12, 1  ;;  %p97_p10 = scmp.lt.s32.totalorder %s1790_s12, 3 }
  0x10   : > { %p1874_p11 = por %p84_p7, %p54_p0  ;;  %p1878_p12 = por %p90_p8, %p60_p3 }
  0x11   : > { %p1882_p13 = pnand %p1478_p9, %p97_p10  ;;  %p1603_p4 = scmp.lt.s32.totalorder %s1790_s12, 2 }
  0x12   : > { %s2578_s21 = scalar_select %p1874_p11, 1, 0 }
  0x13   : > { %s2579_s22 = scalar_select %p1878_p12, 1, 0 }
  0x14   : > { %s2580_s23 = scalar_select %p1882_p13, 1, 0 }
  0x15   : > { %p1590_p2 = pneg %p1882_p13  ;;  %s119_s24 = sand.u32 1, %s1786_s11  }
  0x16   : > { %s1564_s25 = sshll.u32 %s1790_s12, 8  ;;  %p2581_p6 = scmp.eq.s32.totalorder %s1843_s13, 0 }
  0x17   : > { %p1896_p7 = pnand %p1603_p4, %p1861_p5  ;;  %s1481_s27 = sshll.u32 %s119_s24, 6 }
  0x18   : > { %p1591_p0 = pnand %p1590_p2, %p2581_p6  ;;  %s1792_s28 = smov [#allocation2]  }
  0x19   : > { %s1906_s5 = scalar_lea.hbm %s2570_s1, %s1564_s25  ;;  %s123_s6 = scalar_lea.vmem [#allocation6], %s1481_s27 }
  0x1a   : > { %1593 = dma.hbm_to_smem (!%p1591_p0), %s2569_s0, 16, %s1792_s28, [#allocation5]  }
  0x1b   : > { %s130_s7 = sshll.u32 %s123_s6, 4  ;;  %s1910_s8 = scalar_lea.sflag [#allocation3], %s119_s24  ;;  %s1908_s7 = int_to_ptr.vmem [resolvable:$true] %s130_s7 }
  0x1c   : > { %s1694_s14 = scalar_lea.hbm %s1906_s5, 1024  ;;  %p1696_p4 = pneg %p1896_p7 }
  0x1d   : > { %p1695_p3 = scmp.ne.s32.totalorder %s1906_s5, %s1694_s14  ;;  %s1699_s19 = scalar_lea.hbm %s2570_s1, 2048 }
  0x1e   : > { %p1700_p8 = scmp.lt.s32.totalorder %s1906_s5, %s2570_s1  ;;  %p1701_p9 = scmp.lt.s32.totalorder %s1699_s19, %s1694_s14 }
  0x1f   : > { %p1697_p5 = pnand %p1696_p4, %p1695_p3 }
  0x20   : > { %p1702_p10 = por %p1701_p9, %p1700_p8 }
  0x21   : > { %p1698_p6 = pneg %p1697_p5 }
  0x23   : > { %p1703_p2 = pnand %p1702_p10, %p1698_p6 }
  0x25   : > { %1706 = shalt.err (!%p1703_p2)
}
  0x26   : > { %s1707_s24 = scalar_lea.vmem %s1908_s7, 1024  ;;  %s1793_s27 = smov [#allocation6]  }
  0x27   : > { %p1708_p0 = scmp.ne.s32.totalorder %s1908_s7, %s1707_s24  ;;  %s1712_s29 = sshll.u32 %s1793_s27, 4  ;;  %s1713_s29 = int_to_ptr.vmem [resolvable:$false] %s1712_s29 }
  0x28   : > { %s1714_s30 = scalar_lea.vmem %s1713_s29, 2048  ;;  %p1715_p5 = scmp.lt.s32.totalorder %s1908_s7, %s1713_s29 }
  0x29   : > { %p1710_p1 = pnand %p1708_p0, %p1696_p4  ;;  %p1716_p12 = scmp.lt.s32.totalorder %s1714_s30, %s1707_s24 }
  0x2b   : > { %p1711_p3 = pneg %p1710_p1  ;;  %p1717_p11 = por %p1716_p12, %p1715_p5 }
  0x2d   : > { %p1718_p13 = pnand %p1717_p11, %p1711_p3 }
  0x2f   : > { %1721 = shalt.err (!%p1718_p13)
}
  0x30   : > { %s1794_s3 = smov 512   ;;  %s1795_s4 = smov 256  }
  0x31   : > { %s1796_s6 = smov 16   ;;  %p2583_p1 = scmp.ne.s32.totalorder %s2580_s23, 0 }
  0x32   : > { %1597 = dma.hbm_to_vmem [thread:$0]  (!%p1896_p7), %s1906_s5, 1024, %s1908_s7, %s1910_s8, %s1794_s3, %s1795_s4, %s1796_s6  }
  0x33   : > { %142 = sbr.rel (%p2583_p1) target bundleno = 321 (0x141), region = 28  ;;  %p2584_p4 = scmp.eq.s32.totalorder (!%p2583_p1), %s1843_s13, 0 }
  0x38   : > { %1765 = dma.done.wait (%p2584_p4), [#allocation5], 16   ;;  %p2585_p6 = pmov %p2584_p4 }
  0x39   : > { %s1938_s14 = sand.u32 1, %s1782_s10   ;;  %p2586_p11 = scmp.ne.s32.totalorder %s2577_s20, 0 }
  0x3a   : > { %1767 = vsyncadd (%p2585_p6), [#allocation5], 4294967280  ;;  %s1486_s16 = sshll.u32 %s1938_s14, 6  ;;  %s149_s17 = scalar_lea.sflag [#allocation3], %s1938_s14 }
  0x3b   : > { %s152_s19 = scalar_lea.vmem [#allocation6], %s1486_s16 }
  0x3c   : > { %1769 = dma.done.wait (%p2586_p11), %s149_s17, 1024  }
  0x3d   : > { %1771 = vsyncadd (%p2586_p11), %s149_s17, 4294966272 }
  0x3e   : > { %157 = sfence }
  0x3f   : > { %s185_s23 = sld [smem:[#allocation2]]  ;;  %v174_v0 = vld [vmem:[%s152_s19] sm:$0xff]  ;;  %v175_v1 = vld [vmem:[%s152_s19 + $0x8] sm:$0xff]  ;;  %v1488_v2 = vld [vmem:[%s152_s19 + $0x10] sm:$0xff]  ;;  %p2595_p13 = scmp.ne.s32.totalorder %s2578_s21, 0 }
  0x40   : > { %s1494_s26 = sld [smem:[#allocation2 + $0x1]]  ;;  %v1489_v3 = vld [vmem:[%s152_s19 + $0x18] sm:$0xff]  ;;  %v1490_v4 = vld [vmem:[%s152_s19 + $0x20] sm:$0xff]  ;;  %v1491_v5 = vld [vmem:[%s152_s19 + $0x28] sm:$0xff] }
  0x41   : > { %s1495_s5 = sld [smem:[#allocation2 + $0x2]]  ;;  %v1492_v7 = vld [vmem:[%s152_s19 + $0x30] sm:$0xff]  ;;  %v1493_v8 = vld [vmem:[%s152_s19 + $0x38] sm:$0xff] }
  0x42   : > { %s1496_s7 = sld [smem:[#allocation2 + $0x3]] }
  0x43   : > { %s1946_s8 = sld [smem:[#allocation2 + $0x8]] }
  0x44   : > { %s1948_s25 = sld [smem:[#allocation2 + $0x4]] }
  0x45   : > { %v186_v6 = vstv %s185_s23  ;;  %s1515_s28 = sld [smem:[#allocation2 + $0x5]] }
  0x46   : > { %v187_v9 = vmul.f32 %v186_v6, %v174_v0  ;;  %v188_v10 = vmul.f32 %v186_v6, %v175_v1  ;;  %v190_v11 = vstv %s1494_s26  ;;  %s1950_s20 = sld [smem:[#allocation2 + $0x6]] }
  0x47   : > { %v191_v12 = vmul.f32 %v1488_v2, %v190_v11  ;;  %v192_v13 = vmul.f32 %v1489_v3, %v190_v11  ;;  %v196_v14 = vstv %s1495_s5  ;;  %s1952_s24 = sld [smem:[#allocation2 + $0x7]] }
  0x48   : > { %v197_v15 = vmul.f32 %v1490_v4, %v196_v14  ;;  %v198_v16 = vmul.f32 %v1491_v5, %v196_v14  ;;  %v202_v17 = vstv %s1496_s7  ;;  %s1955_s27 = sld [smem:[#allocation2 + $0x9]] }
  0x49   : > { %v193_v18 = vadd.f32 %v191_v12, %v187_v9  ;;  %v194_v19 = vadd.f32 %v192_v13, %v188_v10  ;;  %v203_v20 = vmul.f32 %v1492_v7, %v202_v17  ;;  %v204_v21 = vmul.f32 %v1493_v8, %v202_v17  ;;  %s2194_s29 = sld [smem:[#allocation2 + $0xa]] }
  0x4a   : > { %v640_v22 = vstv %s1948_s25  ;;  %v208_v26 = vstv %s1946_s8  ;;  %s2200_s30 = sld [smem:[#allocation2 + $0x12]] }
  0x4b   : > { %v199_v23 = vadd.f32 %v197_v15, %v193_v18  ;;  %v200_v24 = vadd.f32 %v198_v16, %v194_v19  ;;  %v641_v25 = vmul.f32 %v640_v22, %v174_v0  ;;  %v644_v27 = vstv %s1515_s28  ;;  %s2210_s3 = sld [smem:[#allocation2 + $0xb]] }
  0x4c   : > { %v650_v28 = vstv %s1950_s20  ;;  %v645_v31 = vmul.f32 %v1488_v2, %v644_v27  ;;  %v642_v32 = vmul.f32 %v640_v22, %v175_v1  ;;  %v646_v33 = vmul.f32 %v1489_v3, %v644_v27  ;;  %s2212_s4 = sld [smem:[#allocation2 + $0x13]] }
  0x4d   : > { %v205_v29 = vadd.f32 %v203_v20, %v199_v23  ;;  %v206_v30 = vadd.f32 %v204_v21, %v200_v24  ;;  %v651_v34 = vmul.f32 %v1490_v4, %v650_v28  ;;  %v656_v35 = vstv %s1952_s24  ;;  %s2215_s6 = sld [smem:[#allocation2 + $0xc]] }
  0x4e   : > { %v647_v38 = vadd.f32 %v645_v31, %v641_v25  ;;  %v657_v39 = vmul.f32 %v1492_v7, %v656_v35  ;;  %v648_v43 = vadd.f32 %v646_v33, %v642_v32  ;;  %v652_v44 = vmul.f32 %v1491_v5, %v650_v28  ;;  %s2219_s16 = sld [smem:[#allocation2 + $0x14]] }
  0x4f   : > { %v209_v36 = vadd.f32 %v208_v26, %v205_v29  ;;  %v210_v37 = vadd.f32 %v208_v26, %v206_v30  ;;  %v662_v45 = vstv %s1955_s27  ;;  %v658_v51 = vmul.f32 %v1493_v8, %v656_v35  ;;  %s2222_s17 = sld [smem:[#allocation2 + $0xd]] }
  0x50   : > { %v653_v42 = vadd.f32 %v651_v34, %v647_v38  ;;  %v654_v50 = vadd.f32 %v652_v44, %v648_v43  ;;  %v1797_v33 = vmov 683565275   ;;  %v1798_v35 = vmov 2475754826   ;;  %s2229_s19 = sld [smem:[#allocation2 + $0x15]] }
  0x51   : > { %v211_v40 = vsub.f32 0.0, %v209_v36  ;;  %v212_v41 = vsub.f32 0.0, %v210_v37  ;;  %v1799_v37 = vmov 2131351028   ;;  %s2245_s23 = sld [smem:[#allocation2 + $0xe]] }
  0x52   : > { %v659_v48 = vadd.f32 %v657_v39, %v653_v42  ;;  %v660_v54 = vadd.f32 %v658_v51, %v654_v50  ;;  %v1800_v39 = vmov 2102212464   ;;  %s2258_s26 = sld [smem:[#allocation2 + $0x16]] }
  0x53   : > { %v213_v46 = vmul.f32 1.442695, %v211_v40  ;;  %v215_v47 = vmul.f32 1.442695, %v212_v41  ;;  %v1801_v41 = vmov 920167782  }
  0x54   : > { %v663_v49 = vadd.f32 %v662_v45, %v659_v48  ;;  %v664_v55 = vadd.f32 %v662_v45, %v660_v54  ;;  %s2272_s5 = sld [smem:[#allocation2 + $0xf]] }
  0x55   : > { %1651 = vpow2.f32 %v213_v46  ;;  %s2318_s7 = sld [smem:[#allocation2 + $0x17]] }
  0x56   : > { %1653 = vpow2.f32 %v215_v47  ;;  %v665_v52 = vsub.f32 0.0, %v663_v49  ;;  %v666_v57 = vsub.f32 0.0, %v664_v55  ;;  %v1802_v49 = vmov 1326507024   ;;  %s2327_s8 = sld [smem:[#allocation2 + $0x10]] }
  0x57   : > { %s2336_s25 = sld [smem:[#allocation2 + $0x18]] }
  0x58   : > { %v667_v53 = vmul.f32 1.442695, %v665_v52  ;;  %v669_v61 = vmul.f32 1.442695, %v666_v57  ;;  %s2343_s28 = sld [smem:[#allocation2 + $0x11]] }
  0x59   : > { %s2348_s20 = sld [smem:[#allocation2 + $0x19]] }
  0x5a   : > { %1655 = vpow2.f32 %v667_v53  ;;  %s2461_s24 = sld [smem:[#allocation2 + $0x1a]] }
  0x5b   : > { %s2469_s27 = sld [smem:[#allocation2 + $0x1b]] }
  0x62   : > { %v1652_v56 = vpop.eup %1651 }
  0x63   : > { %v1654_v58 = vpop.eup %1653  ;;  %v217_v59 = vadd.f32 1.0, %v1652_v56 }
  0x64   : > { %v218_v60 = vadd.f32 1.0, %v1654_v58 }
  0x65   : > { %1657 = vrcp.f32 %v217_v59 }
  0x66   : > { %1659 = vrcp.f32 %v218_v60 }
  0x67   : > { %v1656_v62 = vpop.eup %1655  ;;  %1661 = vpow2.f32 %v669_v61 }
  0x68   : > { %v671_v63 = vadd.f32 1.0, %v1656_v62 }
  0x6a   : > { %1663 = vrcp.f32 %v671_v63 }
  0x72   : > { %v1658_v0 = vpop.eup %1657 }
  0x73   : > { %v1660_v1 = vpop.eup %1659  ;;  %v1961_v2 = vmul.f32 1.5707964, %v1658_v0 }
  0x74   : > { %v1963_v3 = vmul.f32 1.5707964, %v1660_v1  ;;  %v1662_v8 = vpop.eup %1661 }
  0x75   : > { %v225_v4 = vand.u32 2147483647, %v1961_v2  ;;  %v228_v5 = vand.u32 2139095040, %v1961_v2  ;;  %v672_v18 = vadd.f32 1.0, %v1662_v8 }
  0x76   : > { %v328_v6 = vand.u32 2147483647, %v1963_v3  ;;  %v331_v7 = vand.u32 2139095040, %v1963_v3 }
  0x77   : > { %v229_v9 = vshrl.u32 %v228_v5, 23  ;;  %v1664_v10 = vpop.eup %1663  ;;  %v232_v11 = vand.u32 8388607, %v225_v4  ;;  %1665 = vrcp.f32 %v672_v18 }
  0x78   : > { %v332_v12 = vshrl.u32 %v331_v7, 23  ;;  %v335_v13 = vand.u32 8388607, %v328_v6  ;;  %v1973_v15 = vmul.f32 1.5707964, %v1664_v10 }
  0x79   : > { %v1498_v14 = vadd.s32 4294967169, %v229_v9  ;;  %v233_v19 = vor.u32 8388608, %v232_v11 }
  0x7a   : > { %v1502_v16 = vadd.s32 4294967169, %v332_v12  ;;  %v336_v20 = vor.u32 8388608, %v335_v13  ;;  %v682_v22 = vand.u32 2139095040, %v1973_v15 }
  0x7b   : > { %v235_v17 = vadd.s32 1, %v1498_v14  ;;  %v1976_v28 = vshll.u32 %v233_v19, 8 }
  0x7c   : > { %v338_v21 = vadd.s32 1, %v1502_v16  ;;  %v683_v24 = vshrl.u32 %v682_v22, 23  ;;  %v1980_v31 = vshll.u32 %v336_v20, 8 }
  0x7d   : > { %vm236_vm0 = vcmp.gt.s32.totalorder %v235_v17, 0 }
  0x7e   : > { %v237_v23 = vsel %vm236_vm0, %v235_v17, 0  ;;  %vm339_vm1 = vcmp.gt.s32.totalorder %v338_v21, 0  ;;  %v1987_v43 = vadd.s32 4294967169, %v683_v24 }
  0x7f   : > { %v238_v25 = vshrl.u32 %v237_v23, 5  ;;  %v239_v26 = vand.u32 31, %v237_v23  ;;  %v340_v27 = vsel %vm339_vm1, %v338_v21, 0 }
  0x80   : > { %v1978_v29 = vshrl.u32 %v340_v27, 5  ;;  %v342_v30 = vand.u32 31, %v340_v27 }
  0x81   : > { %v240_v32 = vsub.s32 32, %v239_v26  ;;  %v242_v34 = vshll.u32 %v1797_v33, %v239_v26  ;;  %v245_v36 = vshll.u32 %v1798_v35, %v239_v26  ;;  %v248_v38 = vshll.u32 %v1799_v37, %v239_v26 }
  0x82   : > { %v251_v40 = vshll.u32 %v1800_v39, %v239_v26  ;;  %v254_v42 = vshll.u32 %v1801_v41, %v239_v26  ;;  %vm257_vm2 = vcmp.lt.s32.totalorder %v238_v25, 1  ;;  %vm258_vm3 = vcmp.lt.s32.totalorder %v238_v25, 2 }
  0x83   : > { %v241_v44 = vshrl.u32 %v1797_v33, %v240_v32  ;;  %v243_v45 = vshrl.u32 %v1798_v35, %v240_v32  ;;  %v246_v46 = vshrl.u32 %v1799_v37, %v240_v32  ;;  %v249_v47 = vshrl.u32 %v1800_v39, %v240_v32 }
  0x84   : > { %v252_v48 = vshrl.u32 %v1801_v41, %v240_v32  ;;  %v255_v50 = vshrl.u32 %v1802_v49, %v240_v32  ;;  %vm260_vm4 = vcmp.lt.s32.totalorder %v238_v25, 4  ;;  %v343_v54 = vsub.s32 32, %v342_v30  ;;  %v1666_v19 = vpop.eup %1665 }
  0x85   : > { %v244_v51 = vor.u32 %v243_v45, %v242_v34  ;;  %v247_v52 = vor.u32 %v246_v46, %v245_v36  ;;  %v250_v53 = vor.u32 %v249_v47, %v248_v38  ;;  %vm259_vm5 = vcmp.lt.s32.totalorder %v238_v25, 3 }
  0x86   : > { %v253_v55 = vor.u32 %v252_v48, %v251_v40  ;;  %v256_v56 = vor.u32 %v255_v50, %v254_v42  ;;  %v345_v57 = vshll.u32 %v1797_v33, %v342_v30  ;;  %v348_v1 = vshll.u32 %v1798_v35, %v342_v30 }
  0x87   : > { %v261_v58 = vsel %vm257_vm2, %v241_v44, %v244_v51  ;;  %v262_v59 = vsel %vm260_vm4, %v250_v53, 2102212464  ;;  %v265_v60 = vsel %vm257_vm2, %v244_v51, %v247_v52  ;;  %v269_v61 = vsel %vm257_vm2, %v247_v52, %v250_v53 }
  0x88   : > { %v263_v62 = vsel %vm259_vm5, %v247_v52, %v262_v59  ;;  %v266_v63 = vsel %vm260_vm4, %v253_v55, 920167782  ;;  %v270_v0 = vsel %vm260_vm4, %v256_v56, 1326507024  ;;  %v344_v8 = vshrl.u32 %v1797_v33, %v343_v54 }
  0x89   : > { %v267_v5 = vsel %vm259_vm5, %v250_v53, %v266_v63  ;;  %v271_v7 = vsel %vm259_vm5, %v253_v55, %v270_v0  ;;  %v346_v9 = vshrl.u32 %v1798_v35, %v343_v54  ;;  %v264_v10 = vsel %vm258_vm3, %v261_v58, %v263_v62 }
  0x8a   : > { %v268_v11 = vsel %vm258_vm3, %v265_v60, %v267_v5  ;;  %v272_v12 = vsel %vm258_vm3, %v269_v61, %v271_v7  ;;  %v349_v13 = vshrl.u32 %v1799_v37, %v343_v54  ;;  %v351_v22 = vshll.u32 %v1799_v37, %v342_v30 }
  0x8b   : > { %v2007_v14 = vmul.u32.u64.low %v1976_v28, %v272_v12  ;;  %v2008_v16 = vmul.u32.u64.high %v1976_v28, %v272_v12, %v2007_v14  ;;  %v2011_v17 = vmul.u32.u64.low %v1976_v28, %v268_v11  ;;  %v2012_v18 = vmul.u32.u64.high %v1976_v28, %v268_v11, %v2011_v17 }
  0x8c   : > { %v347_v20 = vor.u32 %v346_v9, %v345_v57  ;;  %v350_v21 = vor.u32 %v349_v13, %v348_v1  ;;  %v352_v23 = vshrl.u32 %v1800_v39, %v343_v54  ;;  %v354_v24 = vshll.u32 %v1800_v39, %v342_v30 }
  0x8d   : > { %v355_v25 = vshrl.u32 %v1801_v41, %v343_v54  ;;  %v357_v26 = vshll.u32 %v1801_v41, %v342_v30  ;;  %v358_v27 = vshrl.u32 %v1802_v49, %v343_v54  ;;  %v280_v32 = vmul.u32 %v1976_v28, %v264_v10 }
  0x8e   : > { %v353_v34 = vor.u32 %v352_v23, %v351_v22  ;;  %vm360_vm6 = vcmp.lt.s32.totalorder %v1978_v29, 1  ;;  %vm361_vm7 = vcmp.lt.s32.totalorder %v1978_v29, 2  ;;  %vm282_vm8 = vc.u32 %v2008_v16, %v2011_v17 }
  0x8f   : > { %v283_v36 = vadd.s32 1, %v2012_v18  ;;  %v356_v38 = vor.u32 %v355_v25, %v354_v24  ;;  %vm362_vm9 = vcmp.lt.s32.totalorder %v1978_v29, 3  ;;  %v359_v40 = vor.u32 %v358_v27, %v357_v26 }
  0x90   : > { %vm363_vm10 = vcmp.lt.s32.totalorder %v1978_v29, 4  ;;  %v364_v30 = vsel %vm360_vm6, %v344_v8, %v347_v20  ;;  %v368_v42 = vsel %vm360_vm6, %v347_v20, %v350_v21  ;;  %v372_v46 = vsel %vm360_vm6, %v350_v21, %v353_v34 }
  0x91   : > { %v284_v28 = vsel %vm282_vm8, %v283_v36, %v2012_v18  ;;  %v365_v44 = vsel %vm363_vm10, %v353_v34, 2102212464  ;;  %v369_v45 = vsel %vm363_vm10, %v356_v38, 920167782  ;;  %v373_v51 = vsel %vm363_vm10, %v359_v40, 1326507024 }
  0x92   : > { %v285_v47 = vadd.s32 %v284_v28, %v280_v32  ;;  %v366_v48 = vsel %vm362_vm9, %v350_v21, %v365_v44  ;;  %v370_v50 = vsel %vm362_vm9, %v353_v34, %v369_v45  ;;  %v374_v54 = vsel %vm362_vm9, %v356_v38, %v373_v51 }
  0x93   : > { %v367_v52 = vsel %vm361_vm7, %v364_v30, %v366_v48  ;;  %v371_v53 = vsel %vm361_vm7, %v368_v42, %v370_v50  ;;  %v689_v55 = vadd.s32 1, %v1987_v43  ;;  %v375_v57 = vsel %vm361_vm7, %v372_v46, %v374_v54 }
  0x94   : > { %v286_v56 = vadd.s32 536870912, %v285_v47  ;;  %v2038_v58 = vmul.u32.u64.low %v1980_v31, %v371_v53  ;;  %v2039_v59 = vmul.u32.u64.high %v1980_v31, %v371_v53, %v2038_v58  ;;  %v383_v0 = vmul.u32 %v1980_v31, %v367_v52 }
  0x95   : > { %v2043_v60 = vmul.u32.u64.low %v1980_v31, %v375_v57  ;;  %v2044_v61 = vmul.u32.u64.high %v1980_v31, %v375_v57, %v2043_v60  ;;  %vm690_vm11 = vcmp.gt.s32.totalorder %v689_v55, 0  ;;  %v679_v10 = vand.u32 2147483647, %v1973_v15 }
  0x96   : > { %v2046_v62 = vshrl.u32 %v286_v56, 30  ;;  %v691_v63 = vsel %vm690_vm11, %v689_v55, 0  ;;  %v386_v29 = vadd.s32 1, %v2039_v59  ;;  %v2061_v18 = vmul.f32 1.5707964, %v1666_v19 }
  0x97   : > { %vm385_vm12 = vc.u32 %v2044_v61, %v2038_v58  ;;  %v693_v1 = vand.u32 31, %v691_v63  ;;  %v686_v20 = vand.u32 8388607, %v679_v10  ;;  %v692_v22 = vshrl.u32 %v691_v63, 5 }
  0x98   : > { %v288_v43 = vshll.u32 %v2046_v62, 30  ;;  %v387_v7 = vsel %vm385_vm12, %v386_v29, %v2039_v59  ;;  %v281_v46 = vadd.s32 %v2011_v17, %v2008_v16  ;;  %v785_v48 = vand.u32 2139095040, %v2061_v18 }
  0x99   : > { %v388_v8 = vadd.s32 %v387_v7, %v383_v0  ;;  %v694_v12 = vsub.s32 32, %v693_v1  ;;  %v705_v23 = vshll.u32 %v1800_v39, %v693_v1  ;;  %v696_v26 = vshll.u32 %v1797_v33, %v693_v1 }
  0x9a   : > { %v2053_v5 = vsub.s32 %v285_v47, %v288_v43  ;;  %v699_v32 = vshll.u32 %v1798_v35, %v693_v1  ;;  %v702_v36 = vshll.u32 %v1799_v37, %v693_v1  ;;  %v687_v40 = vor.u32 8388608, %v686_v20 }
  0x9b   : > { %v389_v11 = vadd.s32 536870912, %v388_v8  ;;  %v706_v24 = vshrl.u32 %v1801_v41, %v694_v12  ;;  %v697_v27 = vshrl.u32 %v1798_v35, %v694_v12  ;;  %v700_v19 = vshrl.u32 %v1799_v37, %v694_v12 }
  0x9c   : > { %v291_v9 = vsub.s32 0, %v2053_v5  ;;  %v703_v38 = vshrl.u32 %v1800_v39, %v694_v12  ;;  %v708_v30 = vshll.u32 %v1801_v41, %v693_v1  ;;  %v709_v45 = vshrl.u32 %v1802_v49, %v694_v12 }
  0x9d   : > { %v2059_v13 = vshrl.u32 %v389_v11, 30  ;;  %v707_v44 = vor.u32 %v706_v24, %v705_v23  ;;  %vm714_vm14 = vcmp.lt.s32.totalorder %v692_v22, 4  ;;  %v698_v51 = vor.u32 %v697_v27, %v696_v26 }
  0x9e   : > { %v1499_v31 = vmin.u32 %v291_v9, %v2053_v5  ;;  %v701_v52 = vor.u32 %v700_v19, %v699_v32  ;;  %v704_v53 = vor.u32 %v703_v38, %v702_v36  ;;  %v695_v55 = vshrl.u32 %v1797_v33, %v694_v12 }
  0x9f   : > { %v391_v21 = vshll.u32 %v2059_v13, 30  ;;  %vm711_vm15 = vcmp.lt.s32.totalorder %v692_v22, 1  ;;  %vm713_vm0 = vcmp.lt.s32.totalorder %v692_v22, 3  ;;  %v710_v59 = vor.u32 %v709_v45, %v708_v30 }
  0xa0   : > { %v293_v14 = vclz %v1499_v31  ;;  %v720_v60 = vsel %vm714_vm14, %v707_v44, 920167782  ;;  %v786_v16 = vshrl.u32 %v785_v48, 23  ;;  %vm712_vm1 = vcmp.lt.s32.totalorder %v692_v22, 2 }
  0xa1   : > { %v2071_v34 = vsub.s32 %v388_v8, %v391_v21  ;;  %v716_v17 = vsel %vm714_vm14, %v704_v53, 2102212464  ;;  %v719_v63 = vsel %vm711_vm15, %v698_v51, %v701_v52  ;;  %v721_v0 = vsel %vm713_vm0, %v704_v53, %v720_v60 }
  0xa2   : > { %v1500_v25 = vadd.s32 4294967294, %v293_v14  ;;  %v727_v7 = vshll.u32 %v687_v40, 8  ;;  %v715_v9 = vsel %vm711_vm15, %v695_v55, %v698_v51  ;;  %v723_v11 = vsel %vm711_vm15, %v701_v52, %v704_v53 }
  0xa3   : > { %v394_v28 = vsub.s32 0, %v2071_v34  ;;  %v724_v12 = vsel %vm714_vm14, %v710_v59, 1326507024  ;;  %v717_v31 = vsel %vm713_vm0, %v701_v52, %v716_v17  ;;  %v722_v14 = vsel %vm712_vm1, %v719_v63, %v721_v0 }
  0xa4   : > { %vm1501_vm13 = vcmp.lt.s32.totalorder %v1500_v25, 0  ;;  %v725_v20 = vsel %vm713_vm0, %v707_v44, %v724_v12  ;;  %v1523_v21 = vadd.s32 4294967169, %v786_v16  ;;  %vm227_vm8 = vcmp.lt.s32.totalorder %v1961_v2, 0 }
  0xa5   : > { %v296_v42 = vsel %vm1501_vm13, 0, %v1500_v25  ;;  %v1503_v50 = vmin.u32 %v394_v28, %v2071_v34  ;;  %v726_v23 = vsel %vm712_vm1, %v723_v11, %v725_v20  ;;  %v718_v25 = vsel %vm712_vm1, %v715_v9, %v717_v31 }
  0xa6   : > { %v301_v47 = vsub.s32 4294967266, %v296_v42  ;;  %v297_v54 = vsub.s32 32, %v296_v42  ;;  %v298_v43 = vshll.u32 %v2053_v5, %v296_v42  ;;  %v792_v36 = vadd.s32 1, %v1523_v21 }
  0xa7   : > { %v396_v57 = vclz %v1503_v50  ;;  %v2096_v5 = vmul.u32.u64.low %v727_v7, %v726_v23  ;;  %v2097_v24 = vmul.u32.u64.high %v727_v7, %v726_v23, %v2096_v5  ;;  %v734_v40 = vmul.u32 %v727_v7, %v718_v25 }
  0xa8   : > { %v302_v56 = vadd.s32 127, %v301_v47  ;;  %v299_v29 = vshrl.u32 %v281_v46, %v297_v54  ;;  %v2100_v26 = vmul.u32.u64.low %v727_v7, %v722_v14  ;;  %v2101_v27 = vmul.u32.u64.high %v727_v7, %v722_v14, %v2100_v26 }
  0xa9   : > { %v1504_v1 = vadd.s32 4294967294, %v396_v57  ;;  %vm793_vm4 = vcmp.gt.s32.totalorder %v792_v36, 0  ;;  %v782_v42 = vand.u32 2147483647, %v2061_v18  ;;  %v384_v50 = vadd.s32 %v2038_v58, %v2044_v61 }
  0xaa   : > { %v303_v8 = vshll.u32 %v302_v56, 23  ;;  %v300_v32 = vor.u32 %v299_v29, %v298_v43  ;;  %vm736_vm3 = vc.u32 %v2097_v24, %v2100_v26  ;;  %v737_v30 = vadd.s32 1, %v2101_v27 }
  0xab   : > { %vm1505_vm2 = vcmp.lt.s32.totalorder %v1504_v1, 0  ;;  %v794_v45 = vsel %vm793_vm4, %v792_v36, 0  ;;  %v789_v52 = vand.u32 8388607, %v782_v42  ;;  %vm2135_vm10 = vcmp.le.f32.partialorder %v225_v4, 0.7853982 }
  0xac   : > { %v304_v19 = vor.u32 4788187, %v303_v8  ;;  %v399_v38 = vsel %vm1505_vm2, 0, %v1504_v1  ;;  %v307_v22 = vcvt.s32.f32 %v300_v32  ;;  %v738_v46 = vsel %vm736_vm3, %v737_v30, %v2101_v27 }
  0xad   : > { %v404_v44 = vsub.s32 4294967266, %v399_v38  ;;  %v739_v47 = vadd.s32 %v738_v46, %v734_v40  ;;  %v796_v48 = vand.u32 31, %v794_v45  ;;  %v400_v51 = vsub.s32 32, %v399_v38 }
  0xae   : > { %v305_v28 = vand.u32 2147483647, %v304_v19  ;;  %v795_v0 = vshrl.u32 %v794_v45, 5  ;;  %v401_v7 = vshll.u32 %v2071_v34, %v399_v38  ;;  %v790_v9 = vor.u32 8388608, %v789_v52 }
  0xaf   : > { %v405_v54 = vadd.s32 127, %v404_v44  ;;  %v740_v55 = vadd.s32 536870912, %v739_v47  ;;  %v797_v56 = vsub.s32 32, %v796_v48  ;;  %v799_v57 = vshll.u32 %v1797_v33, %v796_v48 }
  0xb0   : > { %v308_v53 = vmul.f32 %v307_v22, %v305_v28  ;;  %v802_v59 = vshll.u32 %v1798_v35, %v796_v48  ;;  %v805_v60 = vshll.u32 %v1799_v37, %v796_v48  ;;  %v808_v16 = vshll.u32 %v1800_v39, %v796_v48 }
  0xb1   : > { %v2117_v17 = vshrl.u32 %v740_v55, 30  ;;  %v800_v58 = vshrl.u32 %v1798_v35, %v797_v56  ;;  %v803_v61 = vshrl.u32 %v1799_v37, %v797_v56  ;;  %v811_v63 = vshll.u32 %v1801_v41, %v796_v48 }
  0xb2   : > { %v806_v43 = vshrl.u32 %v1800_v39, %v797_v56  ;;  %v809_v29 = vshrl.u32 %v1801_v41, %v797_v56  ;;  %v812_v1 = vshrl.u32 %v1802_v49, %v797_v56  ;;  %v402_v11 = vshrl.u32 %v384_v50, %v400_v51 }
  0xb3   : > { %v742_v8 = vshll.u32 %v2117_v17, 30  ;;  %v406_v12 = vshll.u32 %v405_v54, 23  ;;  %v801_v31 = vor.u32 %v800_v58, %v799_v57  ;;  %v804_v37 = vor.u32 %v803_v61, %v802_v59 }
  0xb4   : > { %v810_v35 = vor.u32 %v809_v29, %v808_v16  ;;  %v807_v20 = vor.u32 %v806_v43, %v805_v60  ;;  %v813_v21 = vor.u32 %v812_v1, %v811_v63  ;;  %v309_v23 = vxor.u32 2147483648, %v308_v53 }
  0xb5   : > { %v743_v14 = vsub.s32 %v739_v47, %v742_v8  ;;  %vm814_vm5 = vcmp.lt.s32.totalorder %v795_v0, 1  ;;  %vm816_vm6 = vcmp.lt.s32.totalorder %v795_v0, 3  ;;  %vm817_vm7 = vcmp.lt.s32.totalorder %v795_v0, 4 }
  0xb6   : > { %v823_v41 = vsel %vm817_vm7, %v810_v35, 920167782  ;;  %v403_v49 = vor.u32 %v402_v11, %v401_v7  ;;  %v407_v34 = vor.u32 4788187, %v406_v12  ;;  %vm815_vm9 = vcmp.lt.s32.totalorder %v795_v0, 2 }
  0xb7   : > { %v745_v39 = vsub.s32 0, %v743_v14  ;;  %v827_v5 = vsel %vm817_vm7, %v813_v21, 1326507024  ;;  %v822_v27 = vsel %vm814_vm5, %v801_v31, %v804_v37  ;;  %v824_v32 = vsel %vm816_vm6, %v807_v20, %v823_v41 }
  0xb8   : > { %v826_v19 = vsel %vm814_vm5, %v804_v37, %v807_v20  ;;  %v310_v38 = vsel %vm227_vm8, %v309_v23, %v308_v53  ;;  %v798_v40 = vshrl.u32 %v1797_v33, %v797_v56  ;;  %v830_v30 = vshll.u32 %v790_v9, 8 }
  0xb9   : > { %v1520_v25 = vmin.u32 %v745_v39, %v743_v14  ;;  %v819_v22 = vsel %vm817_vm7, %v807_v20, 2102212464  ;;  %v828_v44 = vsel %vm816_vm6, %v810_v35, %v827_v5  ;;  %v825_v45 = vsel %vm815_vm9, %v822_v27, %v824_v32 }
  0xba   : > { %v829_v46 = vsel %vm815_vm9, %v826_v19, %v828_v44  ;;  %v313_v4 = vsel %vm2135_vm10, %v1961_v2, %v310_v38  ;;  %v408_v47 = vand.u32 2147483647, %v407_v34  ;;  %v410_v48 = vcvt.s32.f32 %v403_v49 }
  0xbb   : > { %v747_v28 = vclz %v1520_v25  ;;  %v818_v51 = vsel %vm814_vm5, %v798_v40, %v801_v31  ;;  %v820_v33 = vsel %vm816_vm6, %v804_v37, %v819_v22  ;;  %v735_v54 = vadd.s32 %v2100_v26, %v2097_v24 }
  0xbc   : > { %v2151_v52 = vmul.u32.u64.low %v830_v30, %v829_v46  ;;  %v2152_v53 = vmul.u32.u64.high %v830_v30, %v829_v46, %v2151_v52  ;;  %v2156_v55 = vmul.u32.u64.low %v830_v30, %v825_v45  ;;  %v2157_v56 = vmul.u32.u64.high %v830_v30, %v825_v45, %v2156_v55 }
  0xbd   : > { %v1521_v50 = vadd.s32 4294967294, %v747_v28  ;;  %1667 = vcosq.f32 %v313_v4  ;;  %v821_v58 = vsel %vm815_vm9, %v818_v51, %v820_v33  ;;  %v311_v61 = vsub.s32 4, %v2046_v62 }
  0xbe   : > { %1669 = vsinq.f32 %v313_v4  ;;  %v411_v63 = vmul.f32 %v410_v48, %v408_v47  ;;  %vm839_vm12 = vc.u32 %v2152_v53, %v2156_v55  ;;  %v840_v24 = vadd.s32 1, %v2157_v56 }
  0xbf   : > { %vm1522_vm11 = vcmp.lt.s32.totalorder %v1521_v50, 0  ;;  %v837_v26 = vmul.u32 %v830_v30, %v821_v58  ;;  %v312_v0 = vsel %vm227_vm8, %v311_v61, %v2046_v62  ;;  %vm330_vm13 = vcmp.lt.s32.totalorder %v1963_v3, 0 }
  0xc0   : > { %v750_v57 = vsel %vm1522_vm11, 0, %v1521_v50  ;;  %v412_v8 = vxor.u32 2147483648, %v411_v63  ;;  %v841_v9 = vsel %vm839_vm12, %v840_v24, %v2157_v56  ;;  %v414_v31 = vsub.s32 4, %v2059_v13 }
  0xc1   : > { %v751_v59 = vsub.s32 32, %v750_v57  ;;  %v752_v60 = vshll.u32 %v743_v14, %v750_v57  ;;  %v755_v16 = vsub.s32 4294967266, %v750_v57  ;;  %v842_v35 = vadd.s32 %v841_v9, %v837_v26 }
  0xc2   : > { %v314_v37 = vsel %vm2135_vm10, 0, %v312_v0  ;;  %vm2175_vm14 = vcmp.le.f32.partialorder %v328_v6, 0.7853982  ;;  %v413_v21 = vsel %vm330_vm13, %v412_v8, %v411_v63  ;;  %v415_v39 = vsel %vm330_vm13, %v414_v31, %v2059_v13 }
  0xc3   : > { %v753_v43 = vshrl.u32 %v735_v54, %v751_v59  ;;  %v756_v29 = vadd.s32 127, %v755_v16  ;;  %v843_v23 = vadd.s32 536870912, %v842_v35  ;;  %vm681_vm15 = vcmp.lt.s32.totalorder %v1973_v15, 0 }
  0xc4   : > { %v765_v41 = vsub.s32 4, %v2117_v17  ;;  %v416_v5 = vsel %vm2175_vm14, %v1963_v3, %v413_v21  ;;  %v524_v6 = vadd.s32 3, %v314_v37  ;;  %vm2189_vm0 = vcmp.le.f32.partialorder %v679_v10, 0.7853982 }
  0xc5   : > { %v754_v1 = vor.u32 %v753_v43, %v752_v60  ;;  %v757_v7 = vshll.u32 %v756_v29, 23  ;;  %v2182_v49 = vshrl.u32 %v843_v23, 30  ;;  %v318_v19 = vand.u32 3, %v314_v37 }
  0xc6   : > { %v417_v36 = vsel %vm2175_vm14, 0, %v415_v39  ;;  %1671 = vcosq.f32 %v416_v5  ;;  %v766_v10 = vsel %vm681_vm15, %v765_v41, %v2117_v17  ;;  %v525_v28 = vand.u32 3, %v524_v6 }
  0xc7   : > { %v758_v11 = vor.u32 4788187, %v757_v7  ;;  %v761_v12 = vcvt.s32.f32 %v754_v1  ;;  %v845_v13 = vshll.u32 %v2182_v49, 30  ;;  %v628_v22 = vadd.s32 3, %v417_v36 }
  0xc8   : > { %v768_v46 = vsel %vm2189_vm0, 0, %v766_v10  ;;  %vm320_vm1 = vcmp.eq.s32.totalorder %v318_v19, 0  ;;  %vm323_vm2 = vcmp.eq.s32.totalorder %v318_v19, 2  ;;  %v2224_v47 = vand.u32 3, %v417_v36 }
  0xc9   : > { %v759_v14 = vand.u32 2147483647, %v758_v11  ;;  %v2208_v30 = vsub.s32 %v842_v35, %v845_v13  ;;  %vm527_vm3 = vcmp.eq.s32.totalorder %v525_v28, 0  ;;  %vm530_vm4 = vcmp.eq.s32.totalorder %v525_v28, 2 }
  0xca   : > { %v1668_v34 = vpop.eup %1667  ;;  %vm317_vm5 = vweird.f32 %v1961_v2  ;;  %vm319_vm6 = vcmp.lt.s32.totalorder %v318_v19, 2  ;;  %v978_v50 = vadd.s32 3, %v768_v46  ;;  %vm526_vm7 = vcmp.lt.s32.totalorder %v525_v28, 2 }
  0xcb   : > { %v762_v62 = vmul.f32 %v761_v12, %v759_v14  ;;  %v1670_v32 = vpop.eup %1669  ;;  %v848_v44 = vsub.s32 0, %v2208_v30  ;;  %v324_v17 = vxor.u32 2147483648, %v1668_v34  ;;  %v2227_v52 = vand.u32 3, %v628_v22 }
  0xcc   : > { %v321_v45 = vxor.u32 2147483648, %v1670_v32  ;;  %v2232_v59 = vstv %s2194_s29  ;;  %vm426_vm8 = vcmp.eq.s32.totalorder %v2224_v47, 2  ;;  %vm771_vm9 = vweird.f32 %v1973_v15  ;;  %s2477_s29 = sld [smem:[#allocation2 + $0x1c]] }
  0xcd   : > { %v763_v27 = vxor.u32 2147483648, %v762_v62  ;;  %v1524_v4 = vmin.u32 %v848_v44, %v2208_v30  ;;  %v325_v33 = vsel %vm323_vm2, %v324_v17, %v1670_v32  ;;  %v532_v56 = vsel %vm530_vm4, %v324_v17, %v1670_v32 }
  0xce   : > { %v322_v51 = vsel %vm320_vm1, %v1668_v34, %v321_v45  ;;  %v529_v54 = vsel %vm527_vm3, %v1668_v34, %v321_v45  ;;  %v772_v60 = vand.u32 3, %v768_v46  ;;  %v2237_v16 = vstv %s2200_s30  ;;  %s2483_s30 = sld [smem:[#allocation2 + $0x1d]] }
  0xcf   : > { %v764_v38 = vsel %vm681_vm15, %v763_v27, %v762_v62  ;;  %v850_v48 = vclz %v1524_v4  ;;  %v2240_v58 = vstv %s2210_s3  ;;  %v2243_v61 = vstv %s2212_s4  ;;  %s2490_s3 = sld [smem:[#allocation2 + $0x1e]] }
  0xd0   : > { %v767_v40 = vsel %vm2189_vm0, %v1973_v15, %v764_v38  ;;  %v326_v63 = vsel %vm319_vm6, %v322_v51, %v325_v33  ;;  %v838_v43 = vadd.s32 %v2156_v55, %v2152_v53  ;;  %v979_v29 = vand.u32 3, %v978_v50  ;;  %s2492_s4 = sld [smem:[#allocation2 + $0x1f]] }
  0xd1   : > { %1673 = vcosq.f32 %v767_v40  ;;  %v1525_v57 = vadd.s32 4294967294, %v850_v48  ;;  %v533_v24 = vsel %vm526_vm7, %v529_v54, %v532_v56  ;;  %vm634_vm11 = vcmp.eq.s32.totalorder %v2227_v52, 2 }
  0xd2   : > { %1675 = vsinq.f32 %v767_v40  ;;  %v2253_v1 = vstv %s2215_s6  ;;  %v2256_v7 = vstv %s2219_s16  ;;  %v2262_v11 = vstv %s2222_s17  ;;  %s1487_s6 = sshll.u32 %s1938_s14, 5  ;;  %s1565_s17 = sshll.u32 %s1843_s13, 8 }
  0xd3   : > { %1677 = vsinq.f32 %v416_v5  ;;  %vm1526_vm10 = vcmp.lt.s32.totalorder %v1525_v57, 0  ;;  %v2264_v53 = vpop.eup %1671  ;;  %v327_v55 = vsel %vm317_vm5, nan, %v326_v63  ;;  %vm773_vm12 = vcmp.lt.s32.totalorder %v772_v60, 2  ;;  %s173_s16 = scalar_lea.vmem [#allocation7], %s1487_s6  ;;  %s1379_s13 = scalar_lea.sflag [#allocation4], %s1938_s14 }
  0xd4   : > { %v853_v26 = vsel %vm1526_vm10, 0, %v1525_v57  ;;  %vm774_vm13 = vcmp.eq.s32.totalorder %v772_v60, 0  ;;  %vm777_vm14 = vcmp.eq.s32.totalorder %v772_v60, 2  ;;  %vm784_vm15 = vcmp.lt.s32.totalorder %v2061_v18, 0 }
  0xd5   : > { %v854_v8 = vsub.s32 32, %v853_v26  ;;  %v855_v9 = vshll.u32 %v2208_v30, %v853_v26  ;;  %v858_v0 = vsub.s32 4294967266, %v853_v26  ;;  %vm423_vm0 = vcmp.eq.s32.totalorder %v2224_v47, 0 }
  0xd6   : > { %v534_v31 = vsel %vm317_vm5, nan, %v533_v24  ;;  %vm984_vm1 = vcmp.eq.s32.totalorder %v979_v29, 2  ;;  %vm631_vm2 = vcmp.eq.s32.totalorder %v2227_v52, 0  ;;  %vm980_vm3 = vcmp.lt.s32.totalorder %v979_v29, 2 }
  0xd7   : > { %v856_v35 = vshrl.u32 %v838_v43, %v854_v8  ;;  %v859_v14 = vadd.s32 127, %v858_v0  ;;  %vm981_vm4 = vcmp.eq.s32.totalorder %v979_v29, 0  ;;  %v2276_v21 = vstv %s2229_s19  ;;  %s1392_s19 = sshll.u32 %s173_s16, 4  ;;  %s2526_s19 = int_to_ptr.vmem [resolvable:$true] %s1392_s19 }
  0xd8   : > { %v427_v62 = vxor.u32 2147483648, %v2264_v53  ;;  %vm2281_vm5 = vcmp.le.f32.partialorder %v782_v42, 0.7853982  ;;  %v868_v6 = vsub.s32 4, %v2182_v49  ;;  %v2289_v27 = vstv %s2245_s23 }
  0xd9   : > { %v857_v41 = vor.u32 %v856_v35, %v855_v9  ;;  %v860_v34 = vshll.u32 %v859_v14, 23  ;;  %vm422_vm6 = vcmp.lt.s32.totalorder %v2224_v47, 2  ;;  %vm630_vm7 = vcmp.lt.s32.totalorder %v2227_v52, 2 }
  0xda   : > { %v2297_v40 = vstv %s2258_s26  ;;  %v869_v51 = vsel %vm784_vm15, %v868_v6, %v2182_v49  ;;  %v2311_v33 = vstv %s2272_s5  ;;  %s2524_s5 = scalar_lea.hbm %s2571_s2, %s1565_s17 }
  0xdb   : > { %v861_v32 = vor.u32 4788187, %v860_v34  ;;  %v864_v19 = vcvt.s32.f32 %v857_v41 }
  0xdd   : > { %v862_v22 = vand.u32 2147483647, %v861_v32 }
  0xde   : > { %v1674_v12 = vpop.eup %1673 }
  0xdf   : > { %v1676_v37 = vpop.eup %1675  ;;  %v778_v20 = vxor.u32 2147483648, %v1674_v12  ;;  %v865_v50 = vmul.f32 %v864_v19, %v862_v22  ;;  %v2358_v19 = vstv %s2318_s7  ;;  %s1722_s7 = scalar_lea.vmem %s2526_s19, 512 }
  0xe0   : > { %v1678_v23 = vpop.eup %1677  ;;  %v775_v39 = vxor.u32 2147483648, %v1676_v37  ;;  %p1723_p12 = scmp.ne.s32.totalorder %s2526_s19, %s1722_s7 }
  0xe1   : > { %v779_v5 = vsel %vm777_vm14, %v778_v20, %v1676_v37  ;;  %v986_v25 = vsel %vm984_vm1, %v778_v20, %v1676_v37  ;;  %v424_v42 = vxor.u32 2147483648, %v1678_v23  ;;  %v428_v30 = vsel %vm426_vm8, %v427_v62, %v1678_v23 }
  0xe2   : > { %v776_v13 = vsel %vm774_vm13, %v1674_v12, %v775_v39  ;;  %v983_v36 = vsel %vm981_vm4, %v1674_v12, %v775_v39  ;;  %v636_v48 = vsel %vm634_vm11, %v427_v62, %v1678_v23  ;;  %vm420_vm8 = vweird.f32 %v1963_v3  ;;  %p1724_p7 = pnand %p1723_p12, %p2595_p13 }
  0xe3   : > { %v780_v38 = vsel %vm773_vm12, %v776_v13, %v779_v5  ;;  %v987_v10 = vsel %vm980_vm3, %v983_v36, %v986_v25  ;;  %v866_v60 = vxor.u32 2147483648, %v865_v50  ;;  %v425_v29 = vsel %vm423_vm0, %v2264_v53, %v424_v42 }
  0xe4   : > { %v781_v28 = vsel %vm771_vm9, nan, %v780_v38  ;;  %v988_v44 = vsel %vm771_vm9, nan, %v987_v10  ;;  %v633_v9 = vsel %vm631_vm2, %v2264_v53, %v424_v42  ;;  %v429_v41 = vsel %vm422_vm6, %v425_v29, %v428_v30  ;;  %p1725_p8 = pneg %p1724_p7 }
  0xe5   : > { %v1093_v45 = vmul.f32 %v781_v28, %v327_v55  ;;  %v1095_v17 = vmul.f32 %v988_v44, %v327_v55  ;;  %v1097_v46 = vmul.f32 %v781_v28, %v534_v31  ;;  %v1099_v4 = vmul.f32 %v988_v44, %v534_v31 }
  0xe6   : > { %v867_v0 = vsel %vm784_vm15, %v866_v60, %v865_v50  ;;  %v871_v55 = vsel %vm2281_vm5, 0, %v869_v51  ;;  %v637_v34 = vsel %vm630_vm7, %v633_v9, %v636_v48  ;;  %v430_v22 = vsel %vm420_vm8, nan, %v429_v41 }
  0xe7   : > { %v1106_v54 = vmul.f32 %v2232_v59, %v1093_v45  ;;  %v1109_v15 = vmul.f32 %v2237_v16, %v1099_v4  ;;  %v1113_v56 = vmul.f32 %v2237_v16, %v1093_v45  ;;  %v1115_v57 = vmul.f32 %v2232_v59, %v1099_v4 }
  0xe8   : > { %v1119_v63 = vmul.f32 %v2232_v59, %v1095_v17  ;;  %v1121_v43 = vmul.f32 %v2237_v16, %v1097_v46  ;;  %v1125_v49 = vmul.f32 %v2237_v16, %v1095_v17  ;;  %v1127_v8 = vmul.f32 %v2232_v59, %v1097_v46 }
  0xe9   : > { %v1111_v24 = vsub.f32 %v1106_v54, %v1109_v15  ;;  %v1117_v26 = vadd.f32 %v1115_v57, %v1113_v56  ;;  %v870_v31 = vsel %vm2281_vm5, %v2061_v18, %v867_v0  ;;  %v1082_v25 = vadd.s32 3, %v871_v55 }
  0xea   : > { %v1123_v12 = vsub.f32 %v1119_v63, %v1121_v43  ;;  %v1129_v35 = vadd.f32 %v1127_v8, %v1125_v49  ;;  %1679 = vcosq.f32 %v870_v31  ;;  %v638_v44 = vsel %vm420_vm8, nan, %v637_v34 }
  0xeb   : > { %v1132_v14 = vmul.f32 %v2240_v58, %v1111_v24  ;;  %v1139_v37 = vmul.f32 %v2243_v61, %v1111_v24  ;;  %v1145_v23 = vmul.f32 %v2240_v58, %v1117_v26  ;;  %1681 = vsinq.f32 %v870_v31 }
  0xec   : > { %v1135_v53 = vmul.f32 %v2243_v61, %v1123_v12  ;;  %v1141_v20 = vmul.f32 %v2240_v58, %v1123_v12  ;;  %v1147_v62 = vmul.f32 %v2243_v61, %v1129_v35  ;;  %v1151_v39 = vmul.f32 %v2243_v61, %v1117_v26 }
  0xed   : > { %v1153_v2 = vmul.f32 %v2240_v58, %v1129_v35  ;;  %v875_v45 = vand.u32 3, %v871_v55  ;;  %v2373_v17 = vstv %s2327_s8  ;;  %vm874_vm9 = vweird.f32 %v2061_v18  ;;  %s1803_s8 = smov [#allocation7]  }
  0xee   : > { %v1137_v5 = vsub.f32 %v1132_v14, %v1135_v53  ;;  %v1143_v6 = vadd.f32 %v1141_v20, %v1139_v37  ;;  %v1149_v13 = vsub.f32 %v1145_v23, %v1147_v62  ;;  %v1083_v51 = vand.u32 3, %v1082_v25 }
  0xef   : > { %v1155_v32 = vadd.f32 %v1153_v2, %v1151_v39  ;;  %v2377_v54 = vstv %s2336_s25  ;;  %v2380_v15 = vstv %s2343_s28  ;;  %v2383_v56 = vstv %s2348_s20  ;;  %s1726_s25 = sshll.u32 %s1803_s8, 4  ;;  %s1727_s25 = int_to_ptr.vmem [resolvable:$false] %s1726_s25 }
  0xf0   : > { %v1162_v36 = vmul.f32 %v2253_v1, %v1137_v5  ;;  %v1169_v42 = vmul.f32 %v2256_v7, %v1137_v5  ;;  %v1175_v38 = vmul.f32 %v2253_v1, %v1143_v6  ;;  %v1181_v47 = vmul.f32 %v2256_v7, %v1143_v6  ;;  %s1728_s28 = scalar_lea.vmem %s1727_s25, 1024  ;;  %p1729_p9 = scmp.lt.s32.totalorder %s2526_s19, %s1727_s25 }
  0xf1   : > { %v1165_v52 = vmul.f32 %v2256_v7, %v1155_v32  ;;  %v1171_v10 = vmul.f32 %v2253_v1, %v1155_v32  ;;  %v1177_v30 = vmul.f32 %v2256_v7, %v1149_v13  ;;  %v1183_v28 = vmul.f32 %v2253_v1, %v1149_v13  ;;  %p1730_p10 = scmp.lt.s32.totalorder %s1728_s28, %s1722_s7 }
  0xf2   : > { %vm877_vm10 = vcmp.eq.s32.totalorder %v875_v45, 0  ;;  %vm880_vm11 = vcmp.eq.s32.totalorder %v875_v45, 2  ;;  %vm1085_vm12 = vcmp.eq.s32.totalorder %v1083_v51, 0  ;;  %vm1088_vm13 = vcmp.eq.s32.totalorder %v1083_v51, 2 }
  0xf3   : > { %v1167_v46 = vsub.f32 %v1162_v36, %v1165_v52  ;;  %v1173_v4 = vadd.f32 %v1171_v10, %v1169_v42  ;;  %v1179_v48 = vsub.f32 %v1175_v38, %v1177_v30  ;;  %v1185_v50 = vadd.f32 %v1183_v28, %v1181_v47  ;;  %p1731_p2 = por %p1730_p10, %p1729_p9 }
  0xf4   : > { %vm876_vm14 = vcmp.lt.s32.totalorder %v875_v45, 2  ;;  %vm1084_vm15 = vcmp.lt.s32.totalorder %v1083_v51, 2 }
  0xf5   : > { %v1188_v57 = vmul.f32 %v2262_v11, %v1167_v46  ;;  %v1191_v3 = vmul.f32 %v2276_v21, %v1179_v48  ;;  %v1195_v60 = vmul.f32 %v2276_v21, %v1167_v46  ;;  %v1197_v63 = vmul.f32 %v2262_v11, %v1179_v48  ;;  %p1732_p0 = pnand %p1731_p2, %p1725_p8 }
  0xf6   : > { %v1201_v43 = vmul.f32 %v2262_v11, %v1173_v4  ;;  %v1203_v49 = vmul.f32 %v2276_v21, %v1185_v50  ;;  %v1207_v29 = vmul.f32 %v2276_v21, %v1173_v4  ;;  %v1209_v24 = vmul.f32 %v2262_v11, %v1185_v50 }
  0xf7   : > { %v1193_v26 = vsub.f32 %v1188_v57, %v1191_v3  ;;  %v1199_v8 = vadd.f32 %v1197_v63, %v1195_v60  ;;  %v1680_v55 = vpop.eup %1679 }
  0xf8   : > { %v1205_v9 = vsub.f32 %v1201_v43, %v1203_v49  ;;  %v1211_v0 = vadd.f32 %v1209_v24, %v1207_v29  ;;  %v1682_v37 = vpop.eup %1681  ;;  %v881_v53 = vxor.u32 2147483648, %v1680_v55 }
  0xf9   : > { %v1218_v12 = vmul.f32 %v2289_v27, %v1193_v26  ;;  %v1225_v31 = vmul.f32 %v2297_v40, %v1193_v26  ;;  %v1231_v35 = vmul.f32 %v2289_v27, %v1199_v8  ;;  %v1237_v14 = vmul.f32 %v2297_v40, %v1199_v8 }
  0xfa   : > { %v1221_v20 = vmul.f32 %v2297_v40, %v1211_v0  ;;  %v1227_v23 = vmul.f32 %v2289_v27, %v1211_v0  ;;  %v1233_v62 = vmul.f32 %v2297_v40, %v1205_v9  ;;  %v878_v39 = vxor.u32 2147483648, %v1682_v37 }
  0xfb   : > { %v1239_v2 = vmul.f32 %v2289_v27, %v1205_v9  ;;  %v882_v41 = vsel %vm880_vm11, %v881_v53, %v1682_v37  ;;  %v1090_v34 = vsel %vm1088_vm13, %v881_v53, %v1682_v37 }
  0xfc   : > { %v1223_v5 = vsub.f32 %v1218_v12, %v1221_v20  ;;  %v1229_v6 = vadd.f32 %v1227_v23, %v1225_v31  ;;  %v879_v25 = vsel %vm877_vm10, %v1680_v55, %v878_v39  ;;  %v1087_v13 = vsel %vm1085_vm12, %v1680_v55, %v878_v39 }
  0xfd   : > { %v1235_v32 = vsub.f32 %v1231_v35, %v1233_v62  ;;  %v1241_v36 = vadd.f32 %v1239_v2, %v1237_v14  ;;  %v883_v42 = vsel %vm876_vm14, %v879_v25, %v882_v41  ;;  %v1091_v38 = vsel %vm1084_vm15, %v1087_v13, %v1090_v34 }
  0xfe   : > { %v1244_v47 = vmul.f32 %v2311_v33, %v1223_v5  ;;  %v1251_v52 = vmul.f32 %v2358_v19, %v1223_v5  ;;  %v884_v10 = vsel %vm874_vm9, nan, %v883_v42  ;;  %v1092_v30 = vsel %vm874_vm9, nan, %v1091_v38 }
  0xff   : > { %v1247_v28 = vmul.f32 %v2358_v19, %v1235_v32  ;;  %v1253_v45 = vmul.f32 %v2311_v33, %v1235_v32  ;;  %v1094_v46 = vmul.f32 %v884_v10, %v430_v22  ;;  %v1096_v4 = vmul.f32 %v1092_v30, %v430_v22 }
 0x100   : > { %v1098_v48 = vmul.f32 %v884_v10, %v638_v44  ;;  %v1100_v50 = vmul.f32 %v1092_v30, %v638_v44  ;;  %v1257_v3 = vmul.f32 %v2311_v33, %v1229_v6  ;;  %v1259_v60 = vmul.f32 %v2358_v19, %v1241_v36 }
 0x101   : > { %v1249_v51 = vsub.f32 %v1244_v47, %v1247_v28  ;;  %v1255_v57 = vadd.f32 %v1253_v45, %v1251_v52  ;;  %v1107_v63 = vmul.f32 %v2232_v59, %v1094_v46  ;;  %v1114_v18 = vmul.f32 %v2237_v16, %v1094_v46 }
 0x102   : > { %v1110_v43 = vmul.f32 %v2237_v16, %v1100_v50  ;;  %v1116_v49 = vmul.f32 %v2232_v59, %v1100_v50  ;;  %v1120_v29 = vmul.f32 %v2232_v59, %v1096_v4  ;;  %v1122_v22 = vmul.f32 %v2237_v16, %v1098_v48 }
 0x103   : > { %v1126_v44 = vmul.f32 %v2237_v16, %v1096_v4  ;;  %v1128_v24 = vmul.f32 %v2232_v59, %v1098_v48  ;;  %v1261_v9 = vsub.f32 %v1257_v3, %v1259_v60  ;;  %v1263_v0 = vmul.f32 %v2358_v19, %v1229_v6 }
 0x104   : > { %v1112_v26 = vsub.f32 %v1107_v63, %v1110_v43  ;;  %v1118_v8 = vadd.f32 %v1116_v49, %v1114_v18  ;;  %v1124_v55 = vsub.f32 %v1120_v29, %v1122_v22  ;;  %v1265_v31 = vmul.f32 %v2311_v33, %v1241_v36 }
 0x105   : > { %v1130_v12 = vadd.f32 %v1128_v24, %v1126_v44  ;;  %v1274_v35 = vmul.f32 %v2373_v17, %v1249_v51  ;;  %v1281_v2 = vmul.f32 %v2377_v54, %v1249_v51  ;;  %v1287_v41 = vmul.f32 %v2373_v17, %v1255_v57 }
 0x106   : > { %v1133_v14 = vmul.f32 %v2240_v58, %v1112_v26  ;;  %v1140_v37 = vmul.f32 %v2243_v61, %v1112_v26  ;;  %v1146_v53 = vmul.f32 %v2240_v58, %v1118_v8  ;;  %v1152_v16 = vmul.f32 %v2243_v61, %v1118_v8 }
 0x107   : > { %v1136_v59 = vmul.f32 %v2243_v61, %v1124_v55  ;;  %v1142_v20 = vmul.f32 %v2240_v58, %v1124_v55  ;;  %v1148_v23 = vmul.f32 %v2243_v61, %v1130_v12  ;;  %v1154_v62 = vmul.f32 %v2240_v58, %v1130_v12 }
 0x108   : > { %v1267_v39 = vadd.f32 %v1265_v31, %v1263_v0  ;;  %v1289_v34 = vmul.f32 %v2377_v54, %v1261_v9  ;;  %v1293_v61 = vmul.f32 %v2377_v54, %v1255_v57  ;;  %v1295_v3 = vmul.f32 %v2373_v17, %v1261_v9 }
 0x109   : > { %v1138_v5 = vsub.f32 %v1133_v14, %v1136_v59  ;;  %v1144_v6 = vadd.f32 %v1142_v20, %v1140_v37  ;;  %v1150_v25 = vsub.f32 %v1146_v53, %v1148_v23  ;;  %v1156_v13 = vadd.f32 %v1154_v62, %v1152_v16 }
 0x10a   : > { %v1277_v32 = vmul.f32 %v2377_v54, %v1267_v39  ;;  %v1283_v36 = vmul.f32 %v2373_v17, %v1267_v39  ;;  %v1291_v42 = vsub.f32 %v1287_v41, %v1289_v34  ;;  %v1297_v44 = vadd.f32 %v1295_v3, %v1293_v61 }
 0x10b   : > { %v1163_v58 = vmul.f32 %v2253_v1, %v1138_v5  ;;  %v1166_v38 = vmul.f32 %v2256_v7, %v1156_v13  ;;  %v1170_v47 = vmul.f32 %v2256_v7, %v1138_v5  ;;  %v1172_v52 = vmul.f32 %v2253_v1, %v1156_v13 }
 0x10c   : > { %v1176_v10 = vmul.f32 %v2253_v1, %v1144_v6  ;;  %v1178_v30 = vmul.f32 %v2256_v7, %v1150_v25  ;;  %v1182_v28 = vmul.f32 %v2256_v7, %v1144_v6  ;;  %v1184_v45 = vmul.f32 %v2253_v1, %v1150_v25 }
 0x10d   : > { %v1168_v46 = vsub.f32 %v1163_v58, %v1166_v38  ;;  %v1174_v4 = vadd.f32 %v1172_v52, %v1170_v47  ;;  %v1279_v48 = vsub.f32 %v1274_v35, %v1277_v32  ;;  %v1285_v50 = vadd.f32 %v1283_v36, %v1281_v2 }
 0x10e   : > { %v1180_v51 = vsub.f32 %v1176_v10, %v1178_v30  ;;  %v1186_v57 = vadd.f32 %v1184_v45, %v1182_v28  ;;  %v1303_v60 = vmul.f32 %v2383_v56, %v1291_v42  ;;  %v1309_v8 = vmul.f32 %v2380_v15, %v1291_v42 }
 0x10f   : > { %v1189_v63 = vmul.f32 %v2262_v11, %v1168_v46  ;;  %v1196_v43 = vmul.f32 %v2276_v21, %v1168_v46  ;;  %v1202_v18 = vmul.f32 %v2262_v11, %v1174_v4  ;;  %v1208_v7 = vmul.f32 %v2276_v21, %v1174_v4 }
 0x110   : > { %v1192_v1 = vmul.f32 %v2276_v21, %v1180_v51  ;;  %v1198_v49 = vmul.f32 %v2262_v11, %v1180_v51  ;;  %v1204_v29 = vmul.f32 %v2276_v21, %v1186_v57  ;;  %v1210_v22 = vmul.f32 %v2262_v11, %v1186_v57 }
 0x111   : > { %v1300_v24 = vmul.f32 %v2380_v15, %v1279_v48  ;;  %v1307_v26 = vmul.f32 %v2383_v56, %v1279_v48  ;;  %v1313_v14 = vmul.f32 %v2380_v15, %v1285_v50  ;;  %v1315_v21 = vmul.f32 %v2383_v56, %v1297_v44 }
 0x112   : > { %v1194_v9 = vsub.f32 %v1189_v63, %v1192_v1  ;;  %v1200_v0 = vadd.f32 %v1198_v49, %v1196_v43  ;;  %v1206_v55 = vsub.f32 %v1202_v18, %v1204_v29  ;;  %v1212_v12 = vadd.f32 %v1210_v22, %v1208_v7 }
 0x113   : > { %v1305_v31 = vsub.f32 %v1300_v24, %v1303_v60  ;;  %v1311_v35 = vadd.f32 %v1309_v8, %v1307_v26  ;;  %v1317_v41 = vsub.f32 %v1313_v14, %v1315_v21  ;;  %v1319_v34 = vmul.f32 %v2383_v56, %v1285_v50 }
 0x114   : > { %v1219_v11 = vmul.f32 %v2289_v27, %v1194_v9  ;;  %v1222_v37 = vmul.f32 %v2297_v40, %v1212_v12  ;;  %v1226_v53 = vmul.f32 %v2297_v40, %v1194_v9  ;;  %v1228_v16 = vmul.f32 %v2289_v27, %v1212_v12 }
 0x115   : > { %v1232_v59 = vmul.f32 %v2289_v27, %v1200_v0  ;;  %v1234_v20 = vmul.f32 %v2297_v40, %v1206_v55  ;;  %v1238_v23 = vmul.f32 %v2297_v40, %v1200_v0  ;;  %v1240_v62 = vmul.f32 %v2289_v27, %v1206_v55 }
 0x116   : > { %v1224_v39 = vsub.f32 %v1219_v11, %v1222_v37  ;;  %v1230_v2 = vadd.f32 %v1228_v16, %v1226_v53  ;;  %v1321_v25 = vmul.f32 %v2380_v15, %v1297_v44  ;;  %v1325_v13 = vmul.f32 %v1305_v31, %v1305_v31 }
 0x117   : > { %v1236_v5 = vsub.f32 %v1232_v59, %v1234_v20  ;;  %v1242_v6 = vadd.f32 %v1240_v62, %v1238_v23  ;;  %v1327_v52 = vmul.f32 %v1311_v35, %v1311_v35  ;;  %v1329_v10 = vmul.f32 %v1317_v41, %v1317_v41 }
 0x118   : > { %v1245_v32 = vmul.f32 %v2311_v33, %v1224_v39  ;;  %v1252_v36 = vmul.f32 %v2358_v19, %v1224_v39  ;;  %v1258_v40 = vmul.f32 %v2311_v33, %v1230_v2  ;;  %v1264_v27 = vmul.f32 %v2358_v19, %v1230_v2 }
 0x119   : > { %v1248_v42 = vmul.f32 %v2358_v19, %v1236_v5  ;;  %v1254_v61 = vmul.f32 %v2311_v33, %v1236_v5  ;;  %v1260_v58 = vmul.f32 %v2358_v19, %v1242_v6  ;;  %v1266_v38 = vmul.f32 %v2311_v33, %v1242_v6 }
 0x11a   : > { %v1323_v47 = vadd.f32 %v1321_v25, %v1319_v34  ;;  %v1346_v30 = vstv %s2461_s24  ;;  %v1333_v50 = vadd.f32 %v1327_v52, %v1325_v13  ;;  %v1339_v51 = vadd.f32 %v1329_v10, %v1325_v13 }
 0x11b   : > { %v1250_v28 = vsub.f32 %v1245_v32, %v1248_v42  ;;  %v1256_v45 = vadd.f32 %v1254_v61, %v1252_v36  ;;  %v1262_v46 = vsub.f32 %v1258_v40, %v1260_v58  ;;  %v1268_v4 = vadd.f32 %v1266_v38, %v1264_v27 }
 0x11c   : > { %v1331_v48 = vmul.f32 %v1323_v47, %v1323_v47  ;;  %v1350_v57 = vstv %s2469_s27  ;;  %v1362_v26 = vstv %s2477_s29  ;;  %v1366_v8 = vstv %s2483_s30 }
 0x11d   : > { %v1275_v33 = vmul.f32 %v2373_v17, %v1250_v28  ;;  %v1278_v19 = vmul.f32 %v2377_v54, %v1268_v4  ;;  %v1282_v3 = vmul.f32 %v2377_v54, %v1250_v28  ;;  %v1284_v60 = vmul.f32 %v2373_v17, %v1268_v4 }
 0x11e   : > { %v1288_v63 = vmul.f32 %v2373_v17, %v1256_v45  ;;  %v1290_v43 = vmul.f32 %v2377_v54, %v1262_v46  ;;  %v1294_v18 = vmul.f32 %v2377_v54, %v1256_v45  ;;  %v1296_v7 = vmul.f32 %v2373_v17, %v1262_v46 }
 0x11f   : > { %v1280_v1 = vsub.f32 %v1275_v33, %v1278_v19  ;;  %v1286_v49 = vadd.f32 %v1284_v60, %v1282_v3  ;;  %v1335_v29 = vadd.f32 %v1331_v48, %v1329_v10  ;;  %v1341_v22 = vadd.f32 %v1331_v48, %v1327_v52 }
 0x120   : > { %v1292_v44 = vsub.f32 %v1288_v63, %v1290_v43  ;;  %v1298_v24 = vadd.f32 %v1296_v7, %v1294_v18  ;;  %v1356_v11 = vstv %s2490_s3  ;;  %v1372_v37 = vstv %s2492_s4 }
 0x121   : > { %v1301_v9 = vmul.f32 %v2380_v15, %v1280_v1  ;;  %v1308_v0 = vmul.f32 %v2383_v56, %v1280_v1  ;;  %v1314_v54 = vmul.f32 %v2380_v15, %v1286_v49  ;;  %v1320_v17 = vmul.f32 %v2383_v56, %v1286_v49 }
 0x122   : > { %v1304_v55 = vmul.f32 %v2383_v56, %v1292_v44  ;;  %v1310_v12 = vmul.f32 %v2380_v15, %v1292_v44  ;;  %v1316_v31 = vmul.f32 %v2383_v56, %v1298_v24  ;;  %v1322_v35 = vmul.f32 %v2380_v15, %v1298_v24 }
 0x123   : > { %v1337_v14 = vsub.f32 %v1333_v50, %v1335_v29  ;;  %v1343_v21 = vsub.f32 %v1339_v51, %v1341_v22 }
 0x124   : > { %v1306_v53 = vsub.f32 %v1301_v9, %v1304_v55  ;;  %v1312_v16 = vadd.f32 %v1310_v12, %v1308_v0  ;;  %v1318_v59 = vsub.f32 %v1314_v54, %v1316_v31  ;;  %v1324_v20 = vadd.f32 %v1322_v35, %v1320_v17 }
 0x125   : > { %v1347_v23 = vmul.f32 %v1346_v30, %v1337_v14  ;;  %v1351_v62 = vmul.f32 %v1350_v57, %v1343_v21  ;;  %v1363_v39 = vmul.f32 %v1362_v26, %v1337_v14  ;;  %v1367_v2 = vmul.f32 %v1366_v8, %v1343_v21 }
 0x126   : > { %v1326_v41 = vmul.f32 %v1306_v53, %v1306_v53  ;;  %v1328_v34 = vmul.f32 %v1312_v16, %v1312_v16  ;;  %v1330_v56 = vmul.f32 %v1318_v59, %v1318_v59  ;;  %v1332_v15 = vmul.f32 %v1324_v20, %v1324_v20 }
 0x127   : > { %v1353_v5 = vadd.f32 %v1351_v62, %v1347_v23  ;;  %v1369_v6 = vadd.f32 %v1367_v2, %v1363_v39 }
 0x128   : > { %v1334_v25 = vadd.f32 %v1328_v34, %v1326_v41  ;;  %v1336_v13 = vadd.f32 %v1332_v15, %v1330_v56  ;;  %v1340_v32 = vadd.f32 %v1330_v56, %v1326_v41  ;;  %v1342_v36 = vadd.f32 %v1332_v15, %v1328_v34 }
 0x129   : > { %v1357_v40 = vadd.f32 %v1356_v11, %v1353_v5  ;;  %v1373_v27 = vadd.f32 %v1372_v37, %v1369_v6 }
 0x12a   : > { %v1338_v42 = vsub.f32 %v1334_v25, %v1336_v13  ;;  %v1344_v61 = vsub.f32 %v1340_v32, %v1342_v36 }
 0x12b   : > { %1359 = vst [vmem:[%s173_s16] sm:$0xff] %v1357_v40  ;;  %1557 = vst [vmem:[%s173_s16 + $0x10] sm:$0xff] %v1373_v27 }
 0x12c   : > { %v1348_v58 = vmul.f32 %v1346_v30, %v1338_v42  ;;  %v1352_v38 = vmul.f32 %v1350_v57, %v1344_v61  ;;  %v1364_v47 = vmul.f32 %v1362_v26, %v1338_v42  ;;  %v1368_v52 = vmul.f32 %v1366_v8, %v1344_v61 }
 0x12e   : > { %v1354_v10 = vadd.f32 %v1352_v38, %v1348_v58  ;;  %v1370_v28 = vadd.f32 %v1368_v52, %v1364_v47 }
 0x130   : > { %v1358_v45 = vadd.f32 %v1356_v11, %v1354_v10  ;;  %v1374_v46 = vadd.f32 %v1372_v37, %v1370_v28 }
 0x132   : > { %1360 = vst [vmem:[%s173_s16 + $0x8] sm:$0xff] %v1358_v45  ;;  %1558 = vst [vmem:[%s173_s16 + $0x18] sm:$0xff] %v1374_v46 }
 0x133   : > { %1735 = shalt.err (!%p1732_p0)
}
 0x134   : > { %s1736_s20 = scalar_lea.hbm %s2524_s5, 512  ;;  %s1740_s29 = scalar_lea.hbm %s2571_s2, 1024 }
 0x135   : > { %p1737_p3 = scmp.ne.s32.totalorder %s2524_s5, %s1736_s20  ;;  %p1741_p4 = scmp.lt.s32.totalorder %s2524_s5, %s2571_s2 }
 0x136   : > { %p1742_p6 = scmp.lt.s32.totalorder %s1740_s29, %s1736_s20 }
 0x137   : > { %p1738_p5 = pnand %p1737_p3, %p2595_p13 }
 0x138   : > { %p1743_p11 = por %p1742_p6, %p1741_p4 }
 0x139   : > { %p1739_p1 = pneg %p1738_p5 }
 0x13b   : > { %p1744_p12 = pnand %p1743_p11, %p1739_p1 }
 0x13d   : > { %1747 = shalt.err (!%p1744_p12)
}
 0x13e   : > { %s1804_s4 = smov 256   ;;  %s1805_s6 = smov 512  }
 0x13f   : > { %s1806_s16 = smov 16  }
 0x140   : > { %1588 = dma.vmem_to_hbm [thread:$0]  (%p2595_p13), %s2526_s19, 512, %s2524_s5, %s1379_s13, %s1804_s4, %s1805_s6, %s1806_s16  }
 0x141 PF: > { %s1407_s17 = sand.u32 1, %s1778_s9   ;;  %p2596_p7 = scmp.ne.s32.totalorder %s2579_s22, 0 }
 0x142   : > { %p2597_p8 = scmp.ge.s32.totalorder %s1790_s12, 2  ;;  %s1408_s23 = scalar_lea.sflag [#allocation4], %s1407_s17 }
 0x144   : > { %p1599_p9 = pnand %p2597_p8, %p2596_p7 }
 0x146   : > { %p1600_p10 = pneg %p1599_p9 }
 0x148   : > { %1773 = dma.done.wait (%p1600_p10), %s1408_s23, 512  }
 0x149   : > { %1775 = vsyncadd (%p1600_p10), %s1408_s23, 4294966784  ;;  %p16_p2 = scmp.ge.s32.totalorder %s1847_s15, 4   ;;  %s2598_s9 = smov %s1782_s10 }
 0x14a   : > { %s2599_s10 = smov %s1786_s11  ;;  %s2600_s11 = smov %s1859_s18 }
 0x14b   : > { %s2601_s12 = smov %s1847_s15  ;;  %18 = sbr.rel (!%p16_p2) target bundleno = 6 (0x6), region = 82 }
 0x150   :  { %1413 = vsyncpa [#allocation3], 1 }
 0x151   :  { %1415 = vsyncpa [#allocation3 + $0x1], 1 }
 0x152   :  { %1416 = vsyncpa [#allocation4], 1 }
 0x153   :  { %1418 = vsyncpa [#allocation4 + $0x1], 1 }
 0x154   :  { %1419 = vsyncpa [#allocation5], 1 }
 0x155   :  { %1421 = vsyncpa [#allocation5 + $0x1], 1 }

</bundles_post_ra>
